<compile_context>
chip_gen: v7x
topology: tpu7x:2x2x1
jax: 0.10.0
libtpu: 0.0.40
codegen_flags: <defaults>
</compile_context>

<pallas_src>
import functools
import math

import jax
import jax.numpy as jnp
from jax import lax
from jax.experimental import pallas as pl
from jax.experimental.pallas import tpu as pltpu


# ---------------------------------------------------------------------------
# Kernel 1: fused Q/K/V projection   q/k/v = x @ Wq_t/Wk_t/Wv_t + b{q,k,v}
#   (weights pre-transposed to (H_in, H_out) at load time -> plain MXU matmul)
# ---------------------------------------------------------------------------
def qkv_proj_kernel(x_ref, wq_ref, wk_ref, wv_ref, bq_ref, bk_ref, bv_ref,
                    q_ref, k_ref, v_ref):
    x = x_ref[...]                                      # (TM, H_in), native dtype
    q = jnp.dot(x, wq_ref[...], preferred_element_type=jnp.float32)
    k = jnp.dot(x, wk_ref[...], preferred_element_type=jnp.float32)
    v = jnp.dot(x, wv_ref[...], preferred_element_type=jnp.float32)
    q_ref[...] = (q + bq_ref[...].astype(jnp.float32)).astype(q_ref.dtype)
    k_ref[...] = (k + bk_ref[...].astype(jnp.float32)).astype(k_ref.dtype)
    v_ref[...] = (v + bv_ref[...].astype(jnp.float32)).astype(v_ref.dtype)


def qkv_projection(x2d, wq_t, wk_t, wv_t, bq, bk, bv, *, tile_m=512):
    """x2d: (M, H_in); w*_t: (H_in, H_out) pre-transposed; b*: (H_out,)."""
    M, H_in = x2d.shape
    H_out = wq_t.shape[1]
    tm = min(tile_m, M)

    row_in = pl.BlockSpec((tm, H_in), lambda i: (i, 0))
    row_out = pl.BlockSpec((tm, H_out), lambda i: (i, 0))

    def full(shape):
        return pl.BlockSpec(shape, lambda i: tuple(0 for _ in shape))

    out_sd = jax.ShapeDtypeStruct((M, H_out), x2d.dtype)
    return pl.pallas_call(
        qkv_proj_kernel,
        grid=(pl.cdiv(M, tm),),
        in_specs=[
            row_in,
            full((H_in, H_out)), full((H_in, H_out)), full((H_in, H_out)),
            full((1, H_out)), full((1, H_out)), full((1, H_out)),
        ],
        out_specs=(row_out, row_out, row_out),
        out_shape=(out_sd, out_sd, out_sd),
        compiler_params=pltpu.CompilerParams(
            dimension_semantics=("parallel",),
            vmem_limit_bytes=64 * 1024 * 1024),
    )(x2d, wq_t, wk_t, wv_t,
      bq.reshape(1, H_out), bk.reshape(1, H_out), bv.reshape(1, H_out))


# ---------------------------------------------------------------------------
# Kernel 2: fused multi-head attention + BertSelfOutput
#   per head: s = (q_h*scale) @ k_h^T + mask ; p = softmax(s) ; ctx_h = p @ v_h
#   ctx heads accumulate in a (TQ, H) f32 VMEM scratch (lane-dense slab),
#   then: out = LayerNorm(ctx @ Wo_t + bo + hidden) written in one full store.
# ---------------------------------------------------------------------------
def fused_attn_kernel(q_ref, k_ref, v_ref, mask_ref, h_ref,
                      wo_ref, bo_ref, gamma_ref, beta_ref,
                      o_ref, ctx_ref, *, num_heads, scale, eps):
    tq = q_ref.shape[0]
    seq = k_ref.shape[0]
    head_dim = q_ref.shape[-1] // num_heads

    # Hoist the mask broadcast out of the per-head loop (no CSE for broadcasts).
    m = jnp.broadcast_to(mask_ref[...].astype(jnp.float32), (tq, seq))

    dn_qk = (((1,), (1,)), ((), ()))                    # contract head_dim of q & k
    for h in range(num_heads):                          # static unroll over heads
        lo = h * head_dim
        hi = lo + head_dim
        qh = q_ref[:, lo:hi] * scale                    # fold scale into (TQ, d) q
        kh = k_ref[:, lo:hi]                            # (S,  d)
        vh = v_ref[:, lo:hi]                            # (S,  d)
        s = lax.dot_general(qh, kh, dn_qk,
                            preferred_element_type=jnp.float32)   # (TQ, S)
        s = s + m
        s = s - jnp.max(s, axis=-1, keepdims=True)
        e = jnp.exp(s)
        inv = pl.reciprocal(jnp.sum(e, axis=-1, keepdims=True), approx=True)
        p = e * inv
        # attention-prob dropout is identity in eval mode; head_mask is None.
        ctx_ref[:, lo:hi] = jnp.dot(p.astype(vh.dtype), vh,
                                    preferred_element_type=jnp.float32)

    # ---- fused BertSelfOutput: dense + bias + residual + LayerNorm ----------
    ctx = ctx_ref[...]                                  # (TQ, H) f32, lane-dense
    dense = jnp.dot(ctx.astype(wo_ref.dtype), wo_ref[...],
                    preferred_element_type=jnp.float32)
    # output dropout is identity in eval mode.
    y = dense + bo_ref[...].astype(jnp.float32) + h_ref[...].astype(jnp.float32)
    mu = jnp.mean(y, axis=-1, keepdims=True)
    var = jnp.mean(jnp.square(y - mu), axis=-1, keepdims=True)
    yn = (y - mu) * lax.rsqrt(var + eps)
    o_ref[...] = (yn * gamma_ref[...].astype(jnp.float32)
                  + beta_ref[...].astype(jnp.float32)).astype(o_ref.dtype)


def fused_attention_output(q, k, v, mask, hidden, wo_t, bo, gamma, beta,
                           *, num_heads, tile_q=256, eps=1e-12):
    """q/k/v/hidden: (B, S, H); mask: (B, 1, 1, S) additive BERT mask."""
    B, S, H = q.shape
    head_dim = H // num_heads
    scale = 1.0 / math.sqrt(head_dim)
    tq = min(tile_q, S)

    row3 = pl.BlockSpec((None, tq, H), lambda b, i: (b, i, 0))
    kv_spec = pl.BlockSpec((None, S, H), lambda b, i: (b, 0, 0))
    mask_spec = pl.BlockSpec((None, None, 1, S), lambda b, i: (b, 0, 0, 0))

    def full(shape):
        return pl.BlockSpec(shape, lambda b, i: tuple(0 for _ in shape))

    return pl.pallas_call(
        functools.partial(fused_attn_kernel, num_heads=num_heads,
                          scale=scale, eps=eps),
        grid=(B, pl.cdiv(S, tq)),
        in_specs=[row3, kv_spec, kv_spec, mask_spec, row3,
                  full((H, H)), full((1, H)), full((1, H)), full((1, H))],
        out_specs=row3,
        out_shape=jax.ShapeDtypeStruct((B, S, H), q.dtype),
        scratch_shapes=[pltpu.VMEM((tq, H), jnp.float32)],
        compiler_params=pltpu.CompilerParams(
            dimension_semantics=("parallel", "parallel"),
            vmem_limit_bytes=64 * 1024 * 1024),
    )(q, k, v, mask, hidden, wo_t,
      bo.reshape(1, H), gamma.reshape(1, H), beta.reshape(1, H))


# ---------------------------------------------------------------------------
# One-time parameter re-layout (done at load time, outside jit):
#   torch nn.Linear weights are (H_out, H_in); kernels consume (H_in, H_out).
# ---------------------------------------------------------------------------
def prepare_params(torch_params):
    return {
        "wq_t": jnp.transpose(torch_params["wq"]),
        "wk_t": jnp.transpose(torch_params["wk"]),
        "wv_t": jnp.transpose(torch_params["wv"]),
        "wo_t": jnp.transpose(torch_params["wo"]),
        "bq": torch_params["bq"], "bk": torch_params["bk"],
        "bv": torch_params["bv"], "bo": torch_params["bo"],
        "gamma": torch_params["gamma"], "beta": torch_params["beta"],
    }


# ---------------------------------------------------------------------------
# Full BertAttention forward (reshapes only; no per-call transposes)
# ---------------------------------------------------------------------------
@functools.partial(jax.jit, static_argnames=("num_heads",))
def bert_attention(hidden, attention_mask, kparams, *, num_heads):
    B, S, H = hidden.shape
    h2d = hidden.reshape(B * S, H)

    q2d, k2d, v2d = qkv_projection(
        h2d, kparams["wq_t"], kparams["wk_t"], kparams["wv_t"],
        kparams["bq"], kparams["bk"], kparams["bv"])

    out = fused_attention_output(
        q2d.reshape(B, S, H), k2d.reshape(B, S, H), v2d.reshape(B, S, H),
        attention_mask, hidden,
        kparams["wo_t"], kparams["bo"], kparams["gamma"], kparams["beta"],
        num_heads=num_heads)
    return out


# ---------------------------------------------------------------------------
# Pure-JAX reference (mirrors the PyTorch forward exactly) for validation
# ---------------------------------------------------------------------------
def bert_attention_ref(hidden, attention_mask, params, num_heads):
    B, S, H = hidden.shape
    d = H // num_heads

    def lin(x, w, b):
        return jnp.einsum("bsh,oh->bso", x, w) + b

    q = lin(hidden, params["wq"], params["bq"]).reshape(B, S, num_heads, d).transpose(0, 2, 1, 3)
    k = lin(hidden, params["wk"], params["bk"]).reshape(B, S, num_heads, d).transpose(0, 2, 1, 3)
    v = lin(hidden, params["wv"], params["bv"]).reshape(B, S, num_heads, d).transpose(0, 2, 1, 3)

    scores = jnp.einsum("bnqd,bnkd->bnqk", q, k) / math.sqrt(d) + attention_mask
    probs = jax.nn.softmax(scores, axis=-1)
    ctx = jnp.einsum("bnqk,bnkd->bnqd", probs, v)
    ctx = ctx.transpose(0, 2, 1, 3).reshape(B, S, H)

    dense = jnp.einsum("bsh,oh->bso", ctx, params["wo"]) + params["bo"]
    y = dense + hidden
    mu = jnp.mean(y, axis=-1, keepdims=True)
    var = jnp.mean(jnp.square(y - mu), axis=-1, keepdims=True)
    yn = (y - mu) / jnp.sqrt(var + 1e-12)
    return yn * params["gamma"] + params["beta"]


if __name__ == "__main__":
    B, S, H, NH = 2, 8, 32, 4     # batch, seq, hidden, num_attention_heads

    key = jax.random.PRNGKey(0)
    ks = jax.random.split(key, 8)

    params = {
        "wq": 0.02 * jax.random.normal(ks[0], (H, H), jnp.float32),
        "bq": 0.01 * jax.random.normal(ks[1], (H,), jnp.float32),
        "wk": 0.02 * jax.random.normal(ks[2], (H, H), jnp.float32),
        "bk": 0.01 * jax.random.normal(ks[3], (H,), jnp.float32),
        "wv": 0.02 * jax.random.normal(ks[4], (H, H), jnp.float32),
        "bv": 0.01 * jax.random.normal(ks[5], (H,), jnp.float32),
        "wo": 0.02 * jax.random.normal(ks[6], (H, H), jnp.float32),
        "bo": jnp.zeros((H,), jnp.float32),
        "gamma": jnp.ones((H,), jnp.float32),
        "beta": jnp.zeros((H,), jnp.float32),
    }
    kparams = prepare_params(params)      # one-time weight re-layout

    hkey, mkey = jax.random.split(jax.random.PRNGKey(1))
    hidden = jax.random.normal(hkey, (B, S, H), jnp.float32)

    # Additive attention mask, BERT convention: 0 for keep, -10000 for masked.
    keep = jnp.ones((B, S), jnp.float32).at[1, S - 2:].set(0.0)
    attention_mask = ((1.0 - keep) * -10000.0).reshape(B, 1, 1, S)

    out = bert_attention(hidden, attention_mask, kparams, num_heads=NH)
    jax.block_until_ready(out)

    ref = bert_attention_ref(hidden, attention_mask, params, NH)
    assert out.shape == (B, S, H)
    # tolerance accounts for the EUP approx-reciprocal in the softmax denominator
    assert jnp.allclose(out, ref, rtol=2e-3, atol=2e-3), "mismatch vs reference"

    print("KERNEL_OK")
</pallas_src>

<mosaic_0001>
module attributes {stable_mosaic.version = 11 : i64} {
  func.func @qkv_proj_kernel(%arg0: i32, %arg1: memref<16x32xf32, #tpu.memory_space<vmem>>, %arg2: memref<32x32xf32, #tpu.memory_space<vmem>>, %arg3: memref<32x32xf32, #tpu.memory_space<vmem>>, %arg4: memref<32x32xf32, #tpu.memory_space<vmem>>, %arg5: memref<1x32xf32, #tpu.memory_space<vmem>>, %arg6: memref<1x32xf32, #tpu.memory_space<vmem>>, %arg7: memref<1x32xf32, #tpu.memory_space<vmem>>, %arg8: memref<16x32xf32, #tpu.memory_space<vmem>>, %arg9: memref<16x32xf32, #tpu.memory_space<vmem>>, %arg10: memref<16x32xf32, #tpu.memory_space<vmem>>) attributes {dimension_semantics = [#tpu.dimension_semantics<parallel>], iteration_bounds = array<i64: 1>, scalar_prefetch = 0 : i64, scratch_operands = 0 : i64, tpu.core_type = #tpu.core_type<tc>, window_params = [{transform_indices = @transform_0, window_bounds = array<i64: 16, 32>}, {pipeline_mode = #tpu.pipeline_mode<synchronous>, transform_indices = @transform_1, window_bounds = array<i64: 32, 32>}, {pipeline_mode = #tpu.pipeline_mode<synchronous>, transform_indices = @transform_2, window_bounds = array<i64: 32, 32>}, {pipeline_mode = #tpu.pipeline_mode<synchronous>, transform_indices = @transform_3, window_bounds = array<i64: 32, 32>}, {pipeline_mode = #tpu.pipeline_mode<synchronous>, transform_indices = @transform_4, window_bounds = array<i64: 1, 32>}, {pipeline_mode = #tpu.pipeline_mode<synchronous>, transform_indices = @transform_5, window_bounds = array<i64: 1, 32>}, {pipeline_mode = #tpu.pipeline_mode<synchronous>, transform_indices = @transform_6, window_bounds = array<i64: 1, 32>}, {transform_indices = @transform_7, window_bounds = array<i64: 16, 32>}, {transform_indices = @transform_8, window_bounds = array<i64: 16, 32>}, {transform_indices = @transform_9, window_bounds = array<i64: 16, 32>}]} {
    %c0 = arith.constant 0 : index
    %c0_0 = arith.constant 0 : index
    %0 = vector.load %arg1[%c0, %c0_0] : memref<16x32xf32, #tpu.memory_space<vmem>>, vector<16x32xf32>
    %c0_1 = arith.constant 0 : index
    %c0_2 = arith.constant 0 : index
    %1 = vector.load %arg2[%c0_1, %c0_2] : memref<32x32xf32, #tpu.memory_space<vmem>>, vector<32x32xf32>
    %cst = arith.constant dense<0.000000e+00> : vector<16x32xf32>
    %2 = tpu.matmul %0, %1, %cst {dimension_numbers = #tpu.dot_dimension_numbers<[1], [0], [0], [1], [0, 0, 1, 1], [], []>} : vector<16x32xf32>, vector<32x32xf32>, vector<16x32xf32> -> vector<16x32xf32>
    %c0_3 = arith.constant 0 : index
    %c0_4 = arith.constant 0 : index
    %3 = vector.load %arg3[%c0_3, %c0_4] : memref<32x32xf32, #tpu.memory_space<vmem>>, vector<32x32xf32>
    %cst_5 = arith.constant dense<0.000000e+00> : vector<16x32xf32>
    %4 = tpu.matmul %0, %3, %cst_5 {dimension_numbers = #tpu.dot_dimension_numbers<[1], [0], [0], [1], [0, 0, 1, 1], [], []>} : vector<16x32xf32>, vector<32x32xf32>, vector<16x32xf32> -> vector<16x32xf32>
    %c0_6 = arith.constant 0 : index
    %c0_7 = arith.constant 0 : index
    %5 = vector.load %arg4[%c0_6, %c0_7] : memref<32x32xf32, #tpu.memory_space<vmem>>, vector<32x32xf32>
    %cst_8 = arith.constant dense<0.000000e+00> : vector<16x32xf32>
    %6 = tpu.matmul %0, %5, %cst_8 {dimension_numbers = #tpu.dot_dimension_numbers<[1], [0], [0], [1], [0, 0, 1, 1], [], []>} : vector<16x32xf32>, vector<32x32xf32>, vector<16x32xf32> -> vector<16x32xf32>
    %c0_9 = arith.constant 0 : index
    %c0_10 = arith.constant 0 : index
    %7 = vector.load %arg5[%c0_9, %c0_10] : memref<1x32xf32, #tpu.memory_space<vmem>>, vector<1x32xf32>
    %8 = vector.broadcast %7 : vector<1x32xf32> to vector<16x32xf32>
    %9 = arith.addf %2, %8 : vector<16x32xf32>
    %c0_11 = arith.constant 0 : index
    %c0_12 = arith.constant 0 : index
    %10 = vector.load %arg8[%c0_11, %c0_12] : memref<16x32xf32, #tpu.memory_space<vmem>>, vector<16x32xf32>
    tpu.vector_store %arg8[%c0_11, %c0_12], %9 {strides = array<i32>} : memref<16x32xf32, #tpu.memory_space<vmem>>, vector<16x32xf32>,
    %c0_13 = arith.constant 0 : index
    %c0_14 = arith.constant 0 : index
    %11 = vector.load %arg6[%c0_13, %c0_14] : memref<1x32xf32, #tpu.memory_space<vmem>>, vector<1x32xf32>
    %12 = vector.broadcast %11 : vector<1x32xf32> to vector<16x32xf32>
    %13 = arith.addf %4, %12 : vector<16x32xf32>
    %c0_15 = arith.constant 0 : index
    %c0_16 = arith.constant 0 : index
    %14 = vector.load %arg9[%c0_15, %c0_16] : memref<16x32xf32, #tpu.memory_space<vmem>>, vector<16x32xf32>
    tpu.vector_store %arg9[%c0_15, %c0_16], %13 {strides = array<i32>} : memref<16x32xf32, #tpu.memory_space<vmem>>, vector<16x32xf32>,
    %c0_17 = arith.constant 0 : index
    %c0_18 = arith.constant 0 : index
    %15 = vector.load %arg7[%c0_17, %c0_18] : memref<1x32xf32, #tpu.memory_space<vmem>>, vector<1x32xf32>
    %16 = vector.broadcast %15 : vector<1x32xf32> to vector<16x32xf32>
    %17 = arith.addf %6, %16 : vector<16x32xf32>
    %c0_19 = arith.constant 0 : index
    %c0_20 = arith.constant 0 : index
    %18 = vector.load %arg10[%c0_19, %c0_20] : memref<16x32xf32, #tpu.memory_space<vmem>>, vector<16x32xf32>
    tpu.vector_store %arg10[%c0_19, %c0_20], %17 {strides = array<i32>} : memref<16x32xf32, #tpu.memory_space<vmem>>, vector<16x32xf32>,
    return
  }
  func.func @transform_0(%arg0: i32) -> (i32, i32) {
    %c0_i32 = arith.constant 0 : i32
    %c0_i32_0 = arith.constant 0 : i32
    return %arg0, %c0_i32 : i32, i32
  }
  func.func @transform_1(%arg0: i32) -> (i32, i32) {
    %c0_i32 = arith.constant 0 : i32
    %c0_i32_0 = arith.constant 0 : i32
    %c0_i32_1 = arith.constant 0 : i32
    return %c0_i32, %c0_i32_0 : i32, i32
  }
  func.func @transform_2(%arg0: i32) -> (i32, i32) {
    %c0_i32 = arith.constant 0 : i32
    %c0_i32_0 = arith.constant 0 : i32
    %c0_i32_1 = arith.constant 0 : i32
    return %c0_i32, %c0_i32_0 : i32, i32
  }
  func.func @transform_3(%arg0: i32) -> (i32, i32) {
    %c0_i32 = arith.constant 0 : i32
    %c0_i32_0 = arith.constant 0 : i32
    %c0_i32_1 = arith.constant 0 : i32
    return %c0_i32, %c0_i32_0 : i32, i32
  }
  func.func @transform_4(%arg0: i32) -> (i32, i32) {
    %c0_i32 = arith.constant 0 : i32
    %c0_i32_0 = arith.constant 0 : i32
    %c0_i32_1 = arith.constant 0 : i32
    return %c0_i32, %c0_i32_0 : i32, i32
  }
  func.func @transform_5(%arg0: i32) -> (i32, i32) {
    %c0_i32 = arith.constant 0 : i32
    %c0_i32_0 = arith.constant 0 : i32
    %c0_i32_1 = arith.constant 0 : i32
    return %c0_i32, %c0_i32_0 : i32, i32
  }
  func.func @transform_6(%arg0: i32) -> (i32, i32) {
    %c0_i32 = arith.constant 0 : i32
    %c0_i32_0 = arith.constant 0 : i32
    %c0_i32_1 = arith.constant 0 : i32
    return %c0_i32, %c0_i32_0 : i32, i32
  }
  func.func @transform_7(%arg0: i32) -> (i32, i32) {
    %c0_i32 = arith.constant 0 : i32
    %c0_i32_0 = arith.constant 0 : i32
    return %arg0, %c0_i32 : i32, i32
  }
  func.func @transform_8(%arg0: i32) -> (i32, i32) {
    %c0_i32 = arith.constant 0 : i32
    %c0_i32_0 = arith.constant 0 : i32
    return %arg0, %c0_i32 : i32, i32
  }
  func.func @transform_9(%arg0: i32) -> (i32, i32) {
    %c0_i32 = arith.constant 0 : i32
    %c0_i32_0 = arith.constant 0 : i32
    return %arg0, %c0_i32 : i32, i32
  }
}

module attributes {stable_mosaic.version = 11 : i64} {
  func.func @fused_attn_kernel(%arg0: i32, %arg1: i32, %arg2: memref<1x8x32xf32, #tpu.memory_space<vmem>>, %arg3: memref<1x8x32xf32, #tpu.memory_space<vmem>>, %arg4: memref<1x8x32xf32, #tpu.memory_space<vmem>>, %arg5: memref<1x1x1x8xf32, #tpu.memory_space<vmem>>, %arg6: memref<1x8x32xf32, #tpu.memory_space<vmem>>, %arg7: memref<32x32xf32, #tpu.memory_space<vmem>>, %arg8: memref<1x32xf32, #tpu.memory_space<vmem>>, %arg9: memref<1x32xf32, #tpu.memory_space<vmem>>, %arg10: memref<1x32xf32, #tpu.memory_space<vmem>>, %arg11: memref<1x8x32xf32, #tpu.memory_space<vmem>>, %arg12: memref<8x32xf32, #tpu.memory_space<vmem>>) attributes {dimension_semantics = [#tpu.dimension_semantics<parallel>, #tpu.dimension_semantics<parallel>], iteration_bounds = array<i64: 2, 1>, scalar_prefetch = 0 : i64, scratch_operands = 1 : i64, tpu.core_type = #tpu.core_type<tc>, window_params = [{transform_indices = @transform_0, window_bounds = array<i64: 1, 8, 32>}, {transform_indices = @transform_1, window_bounds = array<i64: 1, 8, 32>}, {transform_indices = @transform_2, window_bounds = array<i64: 1, 8, 32>}, {transform_indices = @transform_3, window_bounds = array<i64: 1, 1, 1, 8>}, {transform_indices = @transform_4, window_bounds = array<i64: 1, 8, 32>}, {pipeline_mode = #tpu.pipeline_mode<synchronous>, transform_indices = @transform_5, window_bounds = array<i64: 32, 32>}, {pipeline_mode = #tpu.pipeline_mode<synchronous>, transform_indices = @transform_6, window_bounds = array<i64: 1, 32>}, {pipeline_mode = #tpu.pipeline_mode<synchronous>, transform_indices = @transform_7, window_bounds = array<i64: 1, 32>}, {pipeline_mode = #tpu.pipeline_mode<synchronous>, transform_indices = @transform_8, window_bounds = array<i64: 1, 32>}, {transform_indices = @transform_9, window_bounds = array<i64: 1, 8, 32>}]} {
    %c0 = arith.constant 0 : index
    %c0_0 = arith.constant 0 : index
    %c0_1 = arith.constant 0 : index
    %c0_2 = arith.constant 0 : index
    %0 = vector.load %arg5[%c0, %c0_0, %c0_1, %c0_2] : memref<1x1x1x8xf32, #tpu.memory_space<vmem>>, vector<1x1x1x8xf32>
    %1 = vector.shape_cast %0 : vector<1x1x1x8xf32> to vector<1x8xf32>
    %2 = vector.shape_cast %1 : vector<1x8xf32> to vector<1x8xf32>
    %3 = vector.broadcast %2 : vector<1x8xf32> to vector<8x8xf32>
    %c0_3 = arith.constant 0 : index
    %c0_4 = arith.constant 0 : index
    %c0_5 = arith.constant 0 : index
    %4 = vector.load %arg2[%c0_3, %c0_4, %c0_5] : memref<1x8x32xf32, #tpu.memory_space<vmem>>, vector<1x8x8xf32>
    %5 = vector.shape_cast %4 : vector<1x8x8xf32> to vector<8x8xf32>
    %cst = arith.constant 0.353553385 : f32
    %6 = vector.broadcast %cst : f32 to vector<8x8xf32>
    %7 = arith.mulf %5, %6 : vector<8x8xf32>
    %c0_6 = arith.constant 0 : index
    %c0_7 = arith.constant 0 : index
    %c0_8 = arith.constant 0 : index
    %8 = vector.load %arg3[%c0_6, %c0_7, %c0_8] : memref<1x8x32xf32, #tpu.memory_space<vmem>>, vector<1x8x8xf32>
    %9 = vector.shape_cast %8 : vector<1x8x8xf32> to vector<8x8xf32>
    %c0_9 = arith.constant 0 : index
    %c0_10 = arith.constant 0 : index
    %c0_11 = arith.constant 0 : index
    %10 = vector.load %arg4[%c0_9, %c0_10, %c0_11] : memref<1x8x32xf32, #tpu.memory_space<vmem>>, vector<1x8x8xf32>
    %11 = vector.shape_cast %10 : vector<1x8x8xf32> to vector<8x8xf32>
    %cst_12 = arith.constant dense<0.000000e+00> : vector<8x8xf32>
    %12 = tpu.matmul %7, %9, %cst_12 {dimension_numbers = #tpu.dot_dimension_numbers<[1], [1], [0], [0], [0, 0, 1, 0], [], []>} : vector<8x8xf32>, vector<8x8xf32>, vector<8x8xf32> -> vector<8x8xf32>
    %13 = arith.addf %12, %3 : vector<8x8xf32>
    %cst_13 = arith.constant dense<0xFF800000> : vector<8xf32>
    %14 = vector.multi_reduction <maximumf>, %13, %cst_13 [1] : vector<8x8xf32> to vector<8xf32>
    %15 = vector.shape_cast %14 : vector<8xf32> to vector<8x1xf32>
    %16 = vector.broadcast %15 : vector<8x1xf32> to vector<8x8xf32>
    %17 = arith.subf %13, %16 : vector<8x8xf32>
    %18 = math.exp %17 : vector<8x8xf32>
    %cst_14 = arith.constant dense<0.000000e+00> : vector<8xf32>
    %19 = vector.multi_reduction <add>, %18, %cst_14 [1] : vector<8x8xf32> to vector<8xf32>
    %20 = vector.shape_cast %19 : vector<8xf32> to vector<8x1xf32>
    %21 = tpu.reciprocal %20 {approx = true} : vector<8x1xf32> -> vector<8x1xf32>
    %22 = vector.broadcast %21 : vector<8x1xf32> to vector<8x8xf32>
    %23 = arith.mulf %18, %22 : vector<8x8xf32>
    %cst_15 = arith.constant dense<0.000000e+00> : vector<8x8xf32>
    %24 = tpu.matmul %23, %11, %cst_15 {dimension_numbers = #tpu.dot_dimension_numbers<[1], [0], [0], [1], [0, 0, 1, 1], [], []>} : vector<8x8xf32>, vector<8x8xf32>, vector<8x8xf32> -> vector<8x8xf32>
    %c0_16 = arith.constant 0 : index
    %c0_17 = arith.constant 0 : index
    %25 = vector.load %arg12[%c0_16, %c0_17] : memref<8x32xf32, #tpu.memory_space<vmem>>, vector<8x8xf32>
    tpu.vector_store %arg12[%c0_16, %c0_17], %24 {strides = array<i32>} : memref<8x32xf32, #tpu.memory_space<vmem>>, vector<8x8xf32>,
    %c0_18 = arith.constant 0 : index
    %c0_19 = arith.constant 0 : index
    %c8 = arith.constant 8 : index
    %26 = vector.load %arg2[%c0_18, %c0_19, %c8] : memref<1x8x32xf32, #tpu.memory_space<vmem>>, vector<1x8x8xf32>
    %27 = vector.shape_cast %26 : vector<1x8x8xf32> to vector<8x8xf32>
    %cst_20 = arith.constant 0.353553385 : f32
    %28 = vector.broadcast %cst_20 : f32 to vector<8x8xf32>
    %29 = arith.mulf %27, %28 : vector<8x8xf32>
    %c0_21 = arith.constant 0 : index
    %c0_22 = arith.constant 0 : index
    %c8_23 = arith.constant 8 : index
    %30 = vector.load %arg3[%c0_21, %c0_22, %c8_23] : memref<1x8x32xf32, #tpu.memory_space<vmem>>, vector<1x8x8xf32>
    %31 = vector.shape_cast %30 : vector<1x8x8xf32> to vector<8x8xf32>
    %c0_24 = arith.constant 0 : index
    %c0_25 = arith.constant 0 : index
    %c8_26 = arith.constant 8 : index
    %32 = vector.load %arg4[%c0_24, %c0_25, %c8_26] : memref<1x8x32xf32, #tpu.memory_space<vmem>>, vector<1x8x8xf32>
    %33 = vector.shape_cast %32 : vector<1x8x8xf32> to vector<8x8xf32>
    %cst_27 = arith.constant dense<0.000000e+00> : vector<8x8xf32>
    %34 = tpu.matmul %29, %31, %cst_27 {dimension_numbers = #tpu.dot_dimension_numbers<[1], [1], [0], [0], [0, 0, 1, 0], [], []>} : vector<8x8xf32>, vector<8x8xf32>, vector<8x8xf32> -> vector<8x8xf32>
    %35 = arith.addf %34, %3 : vector<8x8xf32>
    %cst_28 = arith.constant dense<0xFF800000> : vector<8xf32>
    %36 = vector.multi_reduction <maximumf>, %35, %cst_28 [1] : vector<8x8xf32> to vector<8xf32>
    %37 = vector.shape_cast %36 : vector<8xf32> to vector<8x1xf32>
    %38 = vector.broadcast %37 : vector<8x1xf32> to vector<8x8xf32>
    %39 = arith.subf %35, %38 : vector<8x8xf32>
    %40 = math.exp %39 : vector<8x8xf32>
    %cst_29 = arith.constant dense<0.000000e+00> : vector<8xf32>
    %41 = vector.multi_reduction <add>, %40, %cst_29 [1] : vector<8x8xf32> to vector<8xf32>
    %42 = vector.shape_cast %41 : vector<8xf32> to vector<8x1xf32>
    %43 = tpu.reciprocal %42 {approx = true} : vector<8x1xf32> -> vector<8x1xf32>
    %44 = vector.broadcast %43 : vector<8x1xf32> to vector<8x8xf32>
    %45 = arith.mulf %40, %44 : vector<8x8xf32>
    %cst_30 = arith.constant dense<0.000000e+00> : vector<8x8xf32>
    %46 = tpu.matmul %45, %33, %cst_30 {dimension_numbers = #tpu.dot_dimension_numbers<[1], [0], [0], [1], [0, 0, 1, 1], [], []>} : vector<8x8xf32>, vector<8x8xf32>, vector<8x8xf32> -> vector<8x8xf32>
    %c0_31 = arith.constant 0 : index
    %c8_32 = arith.constant 8 : index
    %47 = vector.load %arg12[%c0_31, %c8_32] : memref<8x32xf32, #tpu.memory_space<vmem>>, vector<8x8xf32>
    tpu.vector_store %arg12[%c0_31, %c8_32], %46 {strides = array<i32>} : memref<8x32xf32, #tpu.memory_space<vmem>>, vector<8x8xf32>,
    %c0_33 = arith.constant 0 : index
    %c0_34 = arith.constant 0 : index
    %c16 = arith.constant 16 : index
    %48 = vector.load %arg2[%c0_33, %c0_34, %c16] : memref<1x8x32xf32, #tpu.memory_space<vmem>>, vector<1x8x8xf32>
    %49 = vector.shape_cast %48 : vector<1x8x8xf32> to vector<8x8xf32>
    %cst_35 = arith.constant 0.353553385 : f32
    %50 = vector.broadcast %cst_35 : f32 to vector<8x8xf32>
    %51 = arith.mulf %49, %50 : vector<8x8xf32>
    %c0_36 = arith.constant 0 : index
    %c0_37 = arith.constant 0 : index
    %c16_38 = arith.constant 16 : index
    %52 = vector.load %arg3[%c0_36, %c0_37, %c16_38] : memref<1x8x32xf32, #tpu.memory_space<vmem>>, vector<1x8x8xf32>
    %53 = vector.shape_cast %52 : vector<1x8x8xf32> to vector<8x8xf32>
    %c0_39 = arith.constant 0 : index
    %c0_40 = arith.constant 0 : index
    %c16_41 = arith.constant 16 : index
    %54 = vector.load %arg4[%c0_39, %c0_40, %c16_41] : memref<1x8x32xf32, #tpu.memory_space<vmem>>, vector<1x8x8xf32>
    %55 = vector.shape_cast %54 : vector<1x8x8xf32> to vector<8x8xf32>
    %cst_42 = arith.constant dense<0.000000e+00> : vector<8x8xf32>
    %56 = tpu.matmul %51, %53, %cst_42 {dimension_numbers = #tpu.dot_dimension_numbers<[1], [1], [0], [0], [0, 0, 1, 0], [], []>} : vector<8x8xf32>, vector<8x8xf32>, vector<8x8xf32> -> vector<8x8xf32>
    %57 = arith.addf %56, %3 : vector<8x8xf32>
    %cst_43 = arith.constant dense<0xFF800000> : vector<8xf32>
    %58 = vector.multi_reduction <maximumf>, %57, %cst_43 [1] : vector<8x8xf32> to vector<8xf32>
    %59 = vector.shape_cast %58 : vector<8xf32> to vector<8x1xf32>
    %60 = vector.broadcast %59 : vector<8x1xf32> to vector<8x8xf32>
    %61 = arith.subf %57, %60 : vector<8x8xf32>
    %62 = math.exp %61 : vector<8x8xf32>
    %cst_44 = arith.constant dense<0.000000e+00> : vector<8xf32>
    %63 = vector.multi_reduction <add>, %62, %cst_44 [1] : vector<8x8xf32> to vector<8xf32>
    %64 = vector.shape_cast %63 : vector<8xf32> to vector<8x1xf32>
    %65 = tpu.reciprocal %64 {approx = true} : vector<8x1xf32> -> vector<8x1xf32>
    %66 = vector.broadcast %65 : vector<8x1xf32> to vector<8x8xf32>
    %67 = arith.mulf %62, %66 : vector<8x8xf32>
    %cst_45 = arith.constant dense<0.000000e+00> : vector<8x8xf32>
    %68 = tpu.matmul %67, %55, %cst_45 {dimension_numbers = #tpu.dot_dimension_numbers<[1], [0], [0], [1], [0, 0, 1, 1], [], []>} : vector<8x8xf32>, vector<8x8xf32>, vector<8x8xf32> -> vector<8x8xf32>
    %c0_46 = arith.constant 0 : index
    %c16_47 = arith.constant 16 : index
    %69 = vector.load %arg12[%c0_46, %c16_47] : memref<8x32xf32, #tpu.memory_space<vmem>>, vector<8x8xf32>
    tpu.vector_store %arg12[%c0_46, %c16_47], %68 {strides = array<i32>} : memref<8x32xf32, #tpu.memory_space<vmem>>, vector<8x8xf32>,
    %c0_48 = arith.constant 0 : index
    %c0_49 = arith.constant 0 : index
    %c24 = arith.constant 24 : index
    %70 = vector.load %arg2[%c0_48, %c0_49, %c24] : memref<1x8x32xf32, #tpu.memory_space<vmem>>, vector<1x8x8xf32>
    %71 = vector.shape_cast %70 : vector<1x8x8xf32> to vector<8x8xf32>
    %cst_50 = arith.constant 0.353553385 : f32
    %72 = vector.broadcast %cst_50 : f32 to vector<8x8xf32>
    %73 = arith.mulf %71, %72 : vector<8x8xf32>
    %c0_51 = arith.constant 0 : index
    %c0_52 = arith.constant 0 : index
    %c24_53 = arith.constant 24 : index
    %74 = vector.load %arg3[%c0_51, %c0_52, %c24_53] : memref<1x8x32xf32, #tpu.memory_space<vmem>>, vector<1x8x8xf32>
    %75 = vector.shape_cast %74 : vector<1x8x8xf32> to vector<8x8xf32>
    %c0_54 = arith.constant 0 : index
    %c0_55 = arith.constant 0 : index
    %c24_56 = arith.constant 24 : index
    %76 = vector.load %arg4[%c0_54, %c0_55, %c24_56] : memref<1x8x32xf32, #tpu.memory_space<vmem>>, vector<1x8x8xf32>
    %77 = vector.shape_cast %76 : vector<1x8x8xf32> to vector<8x8xf32>
    %cst_57 = arith.constant dense<0.000000e+00> : vector<8x8xf32>
    %78 = tpu.matmul %73, %75, %cst_57 {dimension_numbers = #tpu.dot_dimension_numbers<[1], [1], [0], [0], [0, 0, 1, 0], [], []>} : vector<8x8xf32>, vector<8x8xf32>, vector<8x8xf32> -> vector<8x8xf32>
    %79 = arith.addf %78, %3 : vector<8x8xf32>
    %cst_58 = arith.constant dense<0xFF800000> : vector<8xf32>
    %80 = vector.multi_reduction <maximumf>, %79, %cst_58 [1] : vector<8x8xf32> to vector<8xf32>
    %81 = vector.shape_cast %80 : vector<8xf32> to vector<8x1xf32>
    %82 = vector.broadcast %81 : vector<8x1xf32> to vector<8x8xf32>
    %83 = arith.subf %79, %82 : vector<8x8xf32>
    %84 = math.exp %83 : vector<8x8xf32>
    %cst_59 = arith.constant dense<0.000000e+00> : vector<8xf32>
    %85 = vector.multi_reduction <add>, %84, %cst_59 [1] : vector<8x8xf32> to vector<8xf32>
    %86 = vector.shape_cast %85 : vector<8xf32> to vector<8x1xf32>
    %87 = tpu.reciprocal %86 {approx = true} : vector<8x1xf32> -> vector<8x1xf32>
    %88 = vector.broadcast %87 : vector<8x1xf32> to vector<8x8xf32>
    %89 = arith.mulf %84, %88 : vector<8x8xf32>
    %cst_60 = arith.constant dense<0.000000e+00> : vector<8x8xf32>
    %90 = tpu.matmul %89, %77, %cst_60 {dimension_numbers = #tpu.dot_dimension_numbers<[1], [0], [0], [1], [0, 0, 1, 1], [], []>} : vector<8x8xf32>, vector<8x8xf32>, vector<8x8xf32> -> vector<8x8xf32>
    %c0_61 = arith.constant 0 : index
    %c24_62 = arith.constant 24 : index
    %91 = vector.load %arg12[%c0_61, %c24_62] : memref<8x32xf32, #tpu.memory_space<vmem>>, vector<8x8xf32>
    tpu.vector_store %arg12[%c0_61, %c24_62], %90 {strides = array<i32>} : memref<8x32xf32, #tpu.memory_space<vmem>>, vector<8x8xf32>,
    %c0_63 = arith.constant 0 : index
    %c0_64 = arith.constant 0 : index
    %92 = vector.load %arg12[%c0_63, %c0_64] : memref<8x32xf32, #tpu.memory_space<vmem>>, vector<8x32xf32>
    %c0_65 = arith.constant 0 : index
    %c0_66 = arith.constant 0 : index
    %93 = vector.load %arg7[%c0_65, %c0_66] : memref<32x32xf32, #tpu.memory_space<vmem>>, vector<32x32xf32>
    %cst_67 = arith.constant dense<0.000000e+00> : vector<8x32xf32>
    %94 = tpu.matmul %92, %93, %cst_67 {dimension_numbers = #tpu.dot_dimension_numbers<[1], [0], [0], [1], [0, 0, 1, 1], [], []>} : vector<8x32xf32>, vector<32x32xf32>, vector<8x32xf32> -> vector<8x32xf32>
    %c0_68 = arith.constant 0 : index
    %c0_69 = arith.constant 0 : index
    %95 = vector.load %arg8[%c0_68, %c0_69] : memref<1x32xf32, #tpu.memory_space<vmem>>, vector<1x32xf32>
    %96 = vector.broadcast %95 : vector<1x32xf32> to vector<8x32xf32>
    %97 = arith.addf %94, %96 : vector<8x32xf32>
    %c0_70 = arith.constant 0 : index
    %c0_71 = arith.constant 0 : index
    %c0_72 = arith.constant 0 : index
    %98 = vector.load %arg6[%c0_70, %c0_71, %c0_72] : memref<1x8x32xf32, #tpu.memory_space<vmem>>, vector<1x8x32xf32>
    %99 = vector.shape_cast %98 : vector<1x8x32xf32> to vector<8x32xf32>
    %100 = arith.addf %97, %99 : vector<8x32xf32>
    %cst_73 = arith.constant dense<0.000000e+00> : vector<8xf32>
    %101 = vector.multi_reduction <add>, %100, %cst_73 [1] : vector<8x32xf32> to vector<8xf32>
    %102 = vector.shape_cast %101 : vector<8xf32> to vector<8x1xf32>
    %cst_74 = arith.constant 3.200000e+01 : f32
    %103 = vector.broadcast %cst_74 : f32 to vector<8x1xf32>
    %104 = arith.divf %102, %103 : vector<8x1xf32>
    %105 = vector.broadcast %104 : vector<8x1xf32> to vector<8x32xf32>
    %106 = arith.subf %100, %105 : vector<8x32xf32>
    %107 = arith.mulf %106, %106 : vector<8x32xf32>
    %cst_75 = arith.constant dense<0.000000e+00> : vector<8xf32>
    %108 = vector.multi_reduction <add>, %107, %cst_75 [1] : vector<8x32xf32> to vector<8xf32>
    %109 = vector.shape_cast %108 : vector<8xf32> to vector<8x1xf32>
    %cst_76 = arith.constant 3.200000e+01 : f32
    %110 = vector.broadcast %cst_76 : f32 to vector<8x1xf32>
    %111 = arith.divf %109, %110 : vector<8x1xf32>
    %112 = vector.broadcast %104 : vector<8x1xf32> to vector<8x32xf32>
    %113 = arith.subf %100, %112 : vector<8x32xf32>
    %cst_77 = arith.constant 9.99999996E-13 : f32
    %114 = vector.broadcast %cst_77 : f32 to vector<8x1xf32>
    %115 = arith.addf %111, %114 : vector<8x1xf32>
    %116 = math.rsqrt %115 : vector<8x1xf32>
    %117 = vector.broadcast %116 : vector<8x1xf32> to vector<8x32xf32>
    %118 = arith.mulf %113, %117 : vector<8x32xf32>
    %c0_78 = arith.constant 0 : index
    %c0_79 = arith.constant 0 : index
    %119 = vector.load %arg9[%c0_78, %c0_79] : memref<1x32xf32, #tpu.memory_space<vmem>>, vector<1x32xf32>
    %120 = vector.broadcast %119 : vector<1x32xf32> to vector<8x32xf32>
    %121 = arith.mulf %118, %120 : vector<8x32xf32>
    %c0_80 = arith.constant 0 : index
    %c0_81 = arith.constant 0 : index
    %122 = vector.load %arg10[%c0_80, %c0_81] : memref<1x32xf32, #tpu.memory_space<vmem>>, vector<1x32xf32>
    %123 = vector.broadcast %122 : vector<1x32xf32> to vector<8x32xf32>
    %124 = arith.addf %121, %123 : vector<8x32xf32>
    %c0_82 = arith.constant 0 : index
    %c0_83 = arith.constant 0 : index
    %c0_84 = arith.constant 0 : index
    %125 = vector.load %arg11[%c0_82, %c0_83, %c0_84] : memref<1x8x32xf32, #tpu.memory_space<vmem>>, vector<1x8x32xf32>
    %126 = vector.shape_cast %125 : vector<1x8x32xf32> to vector<8x32xf32>
    %127 = vector.shape_cast %124 : vector<8x32xf32> to vector<1x8x32xf32>
    tpu.vector_store %arg11[%c0_82, %c0_83, %c0_84], %127 {strides = array<i32>} : memref<1x8x32xf32, #tpu.memory_space<vmem>>, vector<1x8x32xf32>,
    return
  }
  func.func @transform_0(%arg0: i32, %arg1: i32) -> (i32, i32, i32) {
    %c0_i32 = arith.constant 0 : i32
    %c0_i32_0 = arith.constant 0 : i32
    return %arg0, %arg1, %c0_i32 : i32, i32, i32
  }
  func.func @transform_1(%arg0: i32, %arg1: i32) -> (i32, i32, i32) {
    %c0_i32 = arith.constant 0 : i32
    %c0_i32_0 = arith.constant 0 : i32
    %c0_i32_1 = arith.constant 0 : i32
    return %arg0, %c0_i32, %c0_i32_0 : i32, i32, i32
  }
  func.func @transform_2(%arg0: i32, %arg1: i32) -> (i32, i32, i32) {
    %c0_i32 = arith.constant 0 : i32
    %c0_i32_0 = arith.constant 0 : i32
    %c0_i32_1 = arith.constant 0 : i32
    return %arg0, %c0_i32, %c0_i32_0 : i32, i32, i32
  }
  func.func @transform_3(%arg0: i32, %arg1: i32) -> (i32, i32, i32, i32) {
    %c0_i32 = arith.constant 0 : i32
    %c0_i32_0 = arith.constant 0 : i32
    %c0_i32_1 = arith.constant 0 : i32
    %c0_i32_2 = arith.constant 0 : i32
    return %arg0, %c0_i32, %c0_i32_0, %c0_i32_1 : i32, i32, i32, i32
  }
  func.func @transform_4(%arg0: i32, %arg1: i32) -> (i32, i32, i32) {
    %c0_i32 = arith.constant 0 : i32
    %c0_i32_0 = arith.constant 0 : i32
    return %arg0, %arg1, %c0_i32 : i32, i32, i32
  }
  func.func @transform_5(%arg0: i32, %arg1: i32) -> (i32, i32) {
    %c0_i32 = arith.constant 0 : i32
    %c0_i32_0 = arith.constant 0 : i32
    %c0_i32_1 = arith.constant 0 : i32
    return %c0_i32, %c0_i32_0 : i32, i32
  }
  func.func @transform_6(%arg0: i32, %arg1: i32) -> (i32, i32) {
    %c0_i32 = arith.constant 0 : i32
    %c0_i32_0 = arith.constant 0 : i32
    %c0_i32_1 = arith.constant 0 : i32
    return %c0_i32, %c0_i32_0 : i32, i32
  }
  func.func @transform_7(%arg0: i32, %arg1: i32) -> (i32, i32) {
    %c0_i32 = arith.constant 0 : i32
    %c0_i32_0 = arith.constant 0 : i32
    %c0_i32_1 = arith.constant 0 : i32
    return %c0_i32, %c0_i32_0 : i32, i32
  }
  func.func @transform_8(%arg0: i32, %arg1: i32) -> (i32, i32) {
    %c0_i32 = arith.constant 0 : i32
    %c0_i32_0 = arith.constant 0 : i32
    %c0_i32_1 = arith.constant 0 : i32
    return %c0_i32, %c0_i32_0 : i32, i32
  }
  func.func @transform_9(%arg0: i32, %arg1: i32) -> (i32, i32, i32) {
    %c0_i32 = arith.constant 0 : i32
    %c0_i32_0 = arith.constant 0 : i32
    return %arg0, %arg1, %c0_i32 : i32, i32, i32
  }
}

</mosaic_0001>

<bundles_post_ra>
// kernel: bert_attention.2
= control target key start
LH: loop header
LB: loop body
LE: loop exit
PB: predicated region body
PF: predicated region fallthrough
CT: control target
= control target key end

     0   :  { %15 = vsyncpa [#allocation3], 0  ;;  %s1008_s0 = inlined_call_operand.hbm [shape: f32[16,32], index: 0, kind: input, shape index: {}]   ;;  %s1009_s1 = inlined_call_operand.hbm [shape: f32[32,32], index: 1, kind: input, shape index: {}]   ;;  %s1010_s2 = inlined_call_operand.hbm [shape: f32[32,32], index: 2, kind: input, shape index: {}]   ;;  %s1011_s3 = inlined_call_operand.hbm [shape: f32[32,32], index: 3, kind: input, shape index: {}]   ;;  %s1012_s4 = inlined_call_operand.hbm [shape: f32[1,32], index: 4, kind: input, shape index: {}]   ;;  %s1013_s5 = inlined_call_operand.hbm [shape: f32[1,32], index: 5, kind: input, shape index: {}]   ;;  %s1014_s6 = inlined_call_operand.hbm [shape: f32[1,32], index: 6, kind: input, shape index: {}]   ;;  %s1015_s7 = inlined_call_operand.hbm [shape: f32[16,32], index: 7, kind: output, shape index: {0}]   ;;  %s1016_s8 = inlined_call_operand.hbm [shape: f32[16,32], index: 8, kind: output, shape index: {1}]   ;;  %s1017_s9 = inlined_call_operand.hbm [shape: f32[16,32], index: 9, kind: output, shape index: {2}]  }
   0x1   :  { %16 = vsyncpa [#allocation6], 0 }
   0x2   :  { %17 = vsyncpa [#allocation9], 0 }
   0x3   :  { %18 = vsyncpa [#allocation12], 0 }
   0x4   :  { %19 = vsyncpa [#allocation4], 0 }
   0x5   :  { %20 = vsyncpa [#allocation16], 0  ;;  %s772_s30 = smov [#allocation5]   ;;  %s773_s11 = smov [#allocation8]  }
   0x6   :  { %s38_s10 = sshll.u32 %s772_s30, 4  ;;  %s62_s12 = sshll.u32 %s773_s11, 4  ;;  %s39_s10 = int_to_ptr.vmem [resolvable:$true] %s38_s10  ;;  %s834_s12 = int_to_ptr.vmem [resolvable:$true] %s62_s12 }
   0x7   :  { %s540_s15 = scalar_lea.hbm %s1009_s1, 512 }
   0x8   :  { %p541_p0 = scmp.ne.s32.totalorder %s1009_s1, %s540_s15  ;;  %p544_p1 = scmp.lt.u32.totalorder %s540_s15, %s1009_s1 }
   0xa   :  { %p546_p2 = pnand %p544_p1, %p541_p0 }
   0xc   :  { %549 = shalt.err (!%p546_p2)
}
   0xd   :  { %s550_s20 = scalar_lea.vmem %s39_s10, 512  ;;  %p555_p4 = scmp.lt.s32.totalorder %s39_s10, %s39_s10 }
   0xe   :  { %p551_p3 = scmp.ne.s32.totalorder %s39_s10, %s550_s20  ;;  %p556_p5 = scmp.lt.s32.totalorder %s550_s20, %s550_s20 }
  0x10   :  { %p557_p6 = por %p556_p5, %p555_p4 }
  0x12   :  { %p558_p7 = pnand %p557_p6, %p551_p3 }
  0x14   :  { %561 = shalt.err (!%p558_p7)
}
  0x15   :  { %s774_s21 = smov 128   ;;  %s775_s22 = smov 8  }
  0x16   :  { %44 = dma.hbm_to_vmem [thread:$0]  %s1009_s1, 512, %s39_s10, [#allocation6], %s774_s21, %s774_s21, %s775_s22  }
  0x17   :  { %s562_s27 = scalar_lea.hbm %s1011_s3, 512 }
  0x18   :  { %p563_p8 = scmp.ne.s32.totalorder %s1011_s3, %s562_s27  ;;  %p566_p9 = scmp.lt.u32.totalorder %s562_s27, %s1011_s3 }
  0x1a   :  { %p568_p10 = pnand %p566_p9, %p563_p8 }
  0x1c   :  { %571 = shalt.err (!%p568_p10)
}
  0x1d   :  { %s572_s13 = scalar_lea.vmem %s834_s12, 512  ;;  %p577_p12 = scmp.lt.s32.totalorder %s834_s12, %s834_s12 }
  0x1e   :  { %p573_p11 = scmp.ne.s32.totalorder %s834_s12, %s572_s13  ;;  %p578_p13 = scmp.lt.s32.totalorder %s572_s13, %s572_s13 }
  0x20   :  { %p579_p0 = por %p578_p13, %p577_p12 }
  0x22   :  { %p580_p1 = pnand %p579_p0, %p573_p11 }
  0x24   :  { %583 = shalt.err (!%p580_p1)
}
  0x25   :  { %68 = dma.hbm_to_vmem [thread:$0]  %s1011_s3, 512, %s834_s12, [#allocation9], %s774_s21, %s774_s21, %s775_s22  }
  0x26   :  { %s776_s14 = smov [#allocation11]   ;;  %s777_s16 = smov [#allocation2]  }
  0x27   :  { %s85_s15 = sshll.u32 %s776_s14, 4  ;;  %s26_s17 = sshll.u32 %s777_s16, 4  ;;  %s86_s15 = int_to_ptr.vmem [resolvable:$true] %s85_s15  ;;  %s871_s17 = int_to_ptr.vmem [resolvable:$true] %s26_s17 }
  0x28   :  { %s584_s20 = scalar_lea.hbm %s1013_s5, 16 }
  0x29   :  { %p585_p2 = scmp.ne.s32.totalorder %s1013_s5, %s584_s20  ;;  %p588_p3 = scmp.lt.u32.totalorder %s584_s20, %s1013_s5 }
  0x2b   :  { %p590_p4 = pnand %p588_p3, %p585_p2 }
  0x2d   :  { %593 = shalt.err (!%p590_p4)
}
  0x2e   :  { %s594_s3 = scalar_lea.vmem %s86_s15, 16  ;;  %s598_s12 = scalar_lea.vmem %s86_s15, 32 }
  0x2f   :  { %p595_p5 = scmp.ne.s32.totalorder %s86_s15, %s594_s3  ;;  %p599_p6 = scmp.lt.s32.totalorder %s86_s15, %s86_s15 }
  0x30   :  { %p600_p7 = scmp.lt.s32.totalorder %s598_s12, %s594_s3 }
  0x32   :  { %p601_p8 = por %p600_p7, %p599_p6 }
  0x34   :  { %p602_p9 = pnand %p601_p8, %p595_p5 }
  0x36   :  { %605 = shalt.err (!%p602_p9)
}
  0x37   :  { %88 = dma.hbm_to_vmem [thread:$0]  %s1013_s5, 16, %s86_s15, [#allocation12]  }
  0x38   :  { %s606_s11 = scalar_lea.hbm %s1008_s0, 256 }
  0x39   :  { %p607_p10 = scmp.ne.s32.totalorder %s1008_s0, %s606_s11  ;;  %p610_p11 = scmp.lt.u32.totalorder %s606_s11, %s1008_s0 }
  0x3b   :  { %p612_p12 = pnand %p610_p11, %p607_p10 }
  0x3d   :  { %615 = shalt.err (!%p612_p12)
}
  0x3e   :  { %s616_s16 = scalar_lea.vmem %s871_s17, 256  ;;  %p621_p0 = scmp.lt.s32.totalorder %s871_s17, %s871_s17 }
  0x3f   :  { %p617_p13 = scmp.ne.s32.totalorder %s871_s17, %s616_s16  ;;  %p622_p1 = scmp.lt.s32.totalorder %s616_s16, %s616_s16 }
  0x41   :  { %p623_p2 = por %p622_p1, %p621_p0 }
  0x43   :  { %p624_p3 = pnand %p623_p2, %p617_p13 }
  0x45   :  { %627 = shalt.err (!%p624_p3)
}
  0x46   :  { %32 = dma.hbm_to_vmem [thread:$0]  %s1008_s0, 256, %s871_s17, [#allocation3], %s774_s21, %s774_s21, %s775_s22  }
  0x47   :  { %s778_s18 = smov [#allocation7]   ;;  %s779_s20 = smov [#allocation10]  }
  0x48   :  { %s50_s19 = sshll.u32 %s778_s18, 4  ;;  %s75_s23 = sshll.u32 %s779_s20, 4  ;;  %s51_s19 = int_to_ptr.vmem [resolvable:$true] %s50_s19  ;;  %s76_s23 = int_to_ptr.vmem [resolvable:$true] %s75_s23 }
  0x49   :  { %s628_s26 = scalar_lea.hbm %s1010_s2, 512 }
  0x4a   :  { %p629_p4 = scmp.ne.s32.totalorder %s1010_s2, %s628_s26  ;;  %p632_p5 = scmp.lt.u32.totalorder %s628_s26, %s1010_s2 }
  0x4c   :  { %p634_p6 = pnand %p632_p5, %p629_p4 }
  0x4e   :  { %637 = shalt.err (!%p634_p6)
}
  0x4f   :  { %s638_s0 = scalar_lea.vmem %s51_s19, 512  ;;  %p643_p8 = scmp.lt.s32.totalorder %s51_s19, %s51_s19 }
  0x50   :  { %p639_p7 = scmp.ne.s32.totalorder %s51_s19, %s638_s0  ;;  %p644_p9 = scmp.lt.s32.totalorder %s638_s0, %s638_s0 }
  0x52   :  { %p645_p10 = por %p644_p9, %p643_p8 }
  0x54   :  { %p646_p11 = pnand %p645_p10, %p639_p7 }
  0x56   :  { %649 = shalt.err (!%p646_p11)
}
  0x57   :  { %56 = dma.hbm_to_vmem [thread:$0]  %s1010_s2, 512, %s51_s19, [#allocation6], %s774_s21, %s774_s21, %s775_s22  }
  0x58   :  { %s650_s13 = scalar_lea.hbm %s1012_s4, 16 }
  0x59   :  { %p651_p12 = scmp.ne.s32.totalorder %s1012_s4, %s650_s13  ;;  %p654_p13 = scmp.lt.u32.totalorder %s650_s13, %s1012_s4 }
  0x5b   :  { %p656_p0 = pnand %p654_p13, %p651_p12 }
  0x5d   :  { %659 = shalt.err (!%p656_p0)
}
  0x5e   :  { %s660_s5 = scalar_lea.vmem %s76_s23, 16  ;;  %s664_s15 = scalar_lea.vmem %s76_s23, 32 }
  0x5f   :  { %p661_p1 = scmp.ne.s32.totalorder %s76_s23, %s660_s5  ;;  %p665_p2 = scmp.lt.s32.totalorder %s76_s23, %s76_s23 }
  0x60   :  { %p666_p3 = scmp.lt.s32.totalorder %s664_s15, %s660_s5 }
  0x62   :  { %p667_p4 = por %p666_p3, %p665_p2 }
  0x64   :  { %p668_p5 = pnand %p667_p4, %p661_p1 }
  0x66   :  { %671 = shalt.err (!%p668_p5)
}
  0x67   :  { %78 = dma.hbm_to_vmem [thread:$0]  %s1012_s4, 16, %s76_s23, [#allocation9]  }
  0x68   :  { %s780_s19 = smov [#allocation13]   ;;  %s672_s26 = scalar_lea.hbm %s1014_s6, 16 }
  0x69   :  { %s95_s20 = sshll.u32 %s780_s19, 4  ;;  %p673_p6 = scmp.ne.s32.totalorder %s1014_s6, %s672_s26  ;;  %s96_s20 = int_to_ptr.vmem [resolvable:$true] %s95_s20 }
  0x6a   :  { %p676_p7 = scmp.lt.u32.totalorder %s672_s26, %s1014_s6 }
  0x6c   :  { %p678_p8 = pnand %p676_p7, %p673_p6 }
  0x6e   :  { %681 = shalt.err (!%p678_p8)
}
  0x6f   :  { %s682_s0 = scalar_lea.vmem %s96_s20, 16  ;;  %s686_s4 = scalar_lea.vmem %s96_s20, 32 }
  0x70   :  { %p683_p9 = scmp.ne.s32.totalorder %s96_s20, %s682_s0  ;;  %p687_p10 = scmp.lt.s32.totalorder %s96_s20, %s96_s20 }
  0x71   :  { %p688_p11 = scmp.lt.s32.totalorder %s686_s4, %s682_s0 }
  0x73   :  { %p689_p12 = por %p688_p11, %p687_p10 }
  0x75   :  { %p690_p13 = pnand %p689_p12, %p683_p9 }
  0x77   :  { %693 = shalt.err (!%p690_p13)
}
  0x78   :  { %98 = dma.hbm_to_vmem [thread:$0]  %s1014_s6, 16, %s96_s20, [#allocation12]  }
  0x79   :  { %760 = dma.done.wait [#allocation3], 256  }
  0x7a   :  { %761 = vsyncadd [#allocation3], 4294967040 }
  0x7b   :  { %762 = dma.done.wait [#allocation6], 1024  }
  0x7c   :  { %763 = vsyncadd [#allocation6], 4294966272 }
  0x7d   :  { %764 = dma.done.wait [#allocation9], 528  }
  0x7e   :  { %765 = vsyncadd [#allocation9], 4294966768 }
  0x7f   :  { %766 = dma.done.wait [#allocation12], 32  }
  0x80   :  { %767 = vsyncadd [#allocation12], 4294967264  ;;  %v122_v0 = vld [vmem:[#allocation5] sm:$0xff]  ;;  %v123_v1 = vld [vmem:[#allocation5 + $0x8] sm:$0xff]  ;;  %vm141_vm0 = vcmask 261120   ;;  %s781_s6 = smov [#allocation14]  }
  0x81   :  { %v124_v2 = vld [vmem:[#allocation5 + $0x10] sm:$0xff]  ;;  %v504_v3 = vpack.c.bf16 %v123_v1, %v122_v0  ;;  %v125_v4 = vld [vmem:[#allocation5 + $0x18] sm:$0xff]  ;;  %v126_v5 = vld [vmem:[#allocation7] sm:$0xff]  ;;  %s398_s29 = sshll.u32 %s781_s6, 4  ;;  %s782_s30 = smov [#allocation15]   ;;  %s399_s29 = int_to_ptr.vmem [resolvable:$true] %s398_s29 }
  0x82   :  { %v127_v6 = vld [vmem:[#allocation7 + $0x8] sm:$0xff]  ;;  %v508_v7 = vpack.c.bf16 %v125_v4, %v124_v2  ;;  %v120_v9 = vld [vmem:[#allocation2] sm:$0xff]  ;;  %v130_v10 = vld [vmem:[#allocation8] sm:$0xff]  ;;  %s410_s11 = sshll.u32 %s782_s30, 4  ;;  %s694_s13 = scalar_lea.vmem %s399_s29, 256  ;;  %s951_s11 = int_to_ptr.vmem [resolvable:$true] %s410_s11 }
  0x83   :  { %v512_v8 = vpack.c.bf16 %v127_v6, %v126_v5  ;;  %505 = vmatprep.subr.bf16.mxu0 %v504_v3  ;;  %479 = vmatprep.mubr.msk.f32.mxu0 %vm141_vm0, %v120_v9  ;;  %v131_v11 = vld [vmem:[#allocation8 + $0x8] sm:$0xff]  ;;  %v128_v12 = vld [vmem:[#allocation7 + $0x10] sm:$0xff]  ;;  %v129_v13 = vld [vmem:[#allocation7 + $0x18] sm:$0xff]  ;;  %p695_p0 = scmp.ne.s32.totalorder %s399_s29, %s694_s13  ;;  %p699_p1 = scmp.lt.s32.totalorder %s399_s29, %s399_s29 }
  0x84   :  { %507 = vmatpush3.bf16.msra.mxu0 %v504_v3  ;;  %v516_v14 = vpack.c.bf16 %v129_v13, %v128_v12  ;;  %v520_v15 = vpack.c.bf16 %v131_v11, %v130_v10  ;;  %v132_v16 = vld [vmem:[#allocation8 + $0x10] sm:$0xff]  ;;  %v133_v17 = vld [vmem:[#allocation8 + $0x18] sm:$0xff]  ;;  %490 = vmatprep.mubr.msk.f32.mxu1 %vm141_vm0, %v120_v9  ;;  %v444_v20 = vld [vmem:[#allocation10] ss:$0 sm:$0xff]  ;;  %p700_p2 = scmp.lt.s32.totalorder %s694_s13, %s694_s13 }
  0x85   :  { %513 = vmatprep.subr.bf16.mxu1 %v512_v8  ;;  %509 = vmatprep.subr.bf16.mxu0 %v508_v7  ;;  %v121_v18 = vld [vmem:[#allocation2 + $0x8] sm:$0xff]  ;;  %v524_v19 = vpack.c.bf16 %v133_v17, %v132_v16  ;;  %v447_v21 = vld [vmem:[#allocation11] ss:$0 sm:$0xff] }
  0x86   :  { %515 = vmatpush3.bf16.msra.mxu1 %v512_v8  ;;  %p701_p3 = por %p700_p2, %p699_p1 }
  0x87   :  { %517 = vmatprep.subr.bf16.mxu1 %v516_v14 }
  0x88   :  { %511 = vmatpush3.bf16.msra.mxu0 %v508_v7  ;;  %p702_p4 = pnand %p701_p3, %p695_p0 }
  0x89   :  { %521 = vmatprep.subr.bf16.mxu0 %v520_v15 }
  0x8a   :  { %519 = vmatpush3.bf16.msra.mxu1 %v516_v14 }
  0x8b   :  { %480 = vmatmul.mubr.msk.f32.vlgmr.msra.gmra.mrb[0].mxu0 %vm141_vm0, %v121_v18 }
  0x8c   :  { %523 = vmatpush3.bf16.msra.mxu0 %v520_v15  ;;  %501 = vmatprep.mubr.msk.f32.mxu0 %vm141_vm0, %v120_v9 }
  0x8d   :  { %491 = vmatmul.mubr.msk.f32.vlgmr.msra.gmra.mrb[0].mxu1 %vm141_vm0, %v121_v18  ;;  %525 = vmatprep.subr.bf16.mxu0 %v524_v19 }
  0x90   :  { %527 = vmatpush3.bf16.msra.mxu0 %v524_v19 }
  0x93   :  { %502 = vmatmul.mubr.msk.f32.vlgmr.msra.gmra.mrb[2].mxu0 %vm141_vm0, %v121_v18 }
 0x15e   :  { %v481_v22 = vpop.f32.mrb[0].mxu0 }
 0x15f   :  { %v220_v23 = vadd.f32 %v481_v22, %v444_v20  ;;  %v214_v24 = vpop.f32.mrb[1].mxu0 }
 0x160   :  { %v492_v25 = vpop.f32.mrb[0].mxu1  ;;  %v215_v26 = vadd.f32 %v444_v20, %v214_v24 }
 0x161   :  { %v304_v27 = vadd.f32 %v492_v25, %v447_v21  ;;  %v298_v28 = vpop.f32.mrb[1].mxu1  ;;  %224 = vst.msk [vmem:[#allocation14 + $0x8] sm:$0xff] %vm141_vm0, %v220_v23 }
 0x162   :  { %v299_v29 = vadd.f32 %v447_v21, %v298_v28  ;;  %223 = vst.msk [vmem:[#allocation14] sm:$0xff] %vm141_vm0, %v215_v26 }
 0x163   :  { %308 = vst.msk [vmem:[#allocation15 + $0x8] sm:$0xff] %vm141_vm0, %v304_v27 }
 0x164   :  { %307 = vst.msk [vmem:[#allocation15] sm:$0xff] %vm141_vm0, %v299_v29 }
 0x165   :  { %705 = shalt.err (!%p702_p4)
}
 0x166   :  { %s706_s14 = scalar_lea.hbm %s1015_s7, 256 }
 0x167   :  { %p707_p5 = scmp.ne.s32.totalorder %s1015_s7, %s706_s14  ;;  %p710_p6 = scmp.lt.u32.totalorder %s706_s14, %s1015_s7 }
 0x169   :  { %p712_p7 = pnand %p710_p6, %p707_p5 }
 0x16b   :  { %715 = shalt.err (!%p712_p7)
}
 0x16c   :  { %404 = dma.vmem_to_hbm [thread:$0]  %s399_s29, 256, %s1015_s7, [#allocation4], %s774_s21, %s774_s21, %s775_s22   ;;  %v450_v30 = vld [vmem:[#allocation13] ss:$0 sm:$0xff] }
 0x16d   :  { %s716_s20 = scalar_lea.vmem %s951_s11, 256  ;;  %p721_p9 = scmp.lt.s32.totalorder %s951_s11, %s951_s11 }
 0x16e   :  { %p717_p8 = scmp.ne.s32.totalorder %s951_s11, %s716_s20  ;;  %p722_p10 = scmp.lt.s32.totalorder %s716_s20, %s716_s20 }
 0x170   :  { %p723_p11 = por %p722_p10, %p721_p9 }
 0x172   :  { %p724_p12 = pnand %p723_p11, %p717_p8 }
 0x174   :  { %727 = shalt.err (!%p724_p12)
}
 0x175   :  { %s728_s26 = scalar_lea.hbm %s1016_s8, 256 }
 0x176   :  { %p729_p13 = scmp.ne.s32.totalorder %s1016_s8, %s728_s26  ;;  %p732_p0 = scmp.lt.u32.totalorder %s728_s26, %s1016_s8 }
 0x178   :  { %p734_p1 = pnand %p732_p0, %p729_p13 }
 0x17a   :  { %737 = shalt.err (!%p734_p1)
}
 0x17b   :  { %416 = dma.vmem_to_hbm [thread:$0]  %s951_s11, 256, %s1016_s8, [#allocation16], %s774_s21, %s774_s21, %s775_s22   ;;  %v503_v31 = vpop.f32.mrb[2].mxu0 }
 0x17c   :  { %s783_s4 = smov [#allocation17]   ;;  %v388_v32 = vadd.f32 %v503_v31, %v450_v30  ;;  %v382_v33 = vpop.f32.mrb[3].mxu0 }
 0x17d   :  { %s422_s23 = sshll.u32 %s783_s4, 4  ;;  %v383_v34 = vadd.f32 %v450_v30, %v382_v33  ;;  %s423_s23 = int_to_ptr.vmem [resolvable:$true] %s422_s23 }
 0x17e   :  { %392 = vst.msk [vmem:[#allocation17 + $0x8] sm:$0xff] %vm141_vm0, %v388_v32  ;;  %s738_s17 = scalar_lea.vmem %s423_s23, 256  ;;  %p743_p3 = scmp.lt.s32.totalorder %s423_s23, %s423_s23 }
 0x17f   :  { %391 = vst.msk [vmem:[#allocation17] sm:$0xff] %vm141_vm0, %v383_v34  ;;  %p739_p2 = scmp.ne.s32.totalorder %s423_s23, %s738_s17  ;;  %p744_p4 = scmp.lt.s32.totalorder %s738_s17, %s738_s17 }
 0x181   :  { %p745_p5 = por %p744_p4, %p743_p3 }
 0x183   :  { %p746_p6 = pnand %p745_p5, %p739_p2 }
 0x185   :  { %749 = shalt.err (!%p746_p6)
}
 0x186   :  { %s750_s29 = scalar_lea.hbm %s1017_s9, 256 }
 0x187   :  { %p751_p7 = scmp.ne.s32.totalorder %s1017_s9, %s750_s29  ;;  %p754_p8 = scmp.lt.u32.totalorder %s750_s29, %s1017_s9 }
 0x189   :  { %p756_p9 = pnand %p754_p8, %p751_p7 }
 0x18b   :  { %759 = shalt.err (!%p756_p9)
}
 0x18c   :  { %428 = dma.vmem_to_hbm [thread:$0]  %s423_s23, 256, %s1017_s9, [#allocation16], %s774_s21, %s774_s21, %s775_s22  }
 0x18d   :  { %768 = dma.done.wait [#allocation4], 256  }
 0x18e   :  { %769 = vsyncadd [#allocation4], 4294967040 }
 0x18f   :  { %770 = dma.done.wait [#allocation16], 512  }
 0x190   :  { %771 = vsyncadd [#allocation16], 4294966784 }
 0x191   :  { %438 = vsyncpa [#allocation3], 1 }
 0x192   :  { %439 = vsyncpa [#allocation6], 1 }
 0x193   :  { %440 = vsyncpa [#allocation9], 1 }
 0x194   :  { %441 = vsyncpa [#allocation12], 1 }
 0x195   :  { %442 = vsyncpa [#allocation4], 1 }
 0x196   :  { %443 = vsyncpa [#allocation16], 1 }

// kernel: bert_attention.3
= control target key start
LH: loop header
LB: loop body
LE: loop exit
PB: predicated region body
PF: predicated region fallthrough
CT: control target
= control target key end

     0   :  { %s2808_s0 = inlined_call_operand.hbm [shape: f32[2,8,32], index: 0, kind: input, shape index: {}]   ;;  %s2809_s1 = inlined_call_operand.hbm [shape: f32[2,8,32], index: 1, kind: input, shape index: {}]   ;;  %s2810_s2 = inlined_call_operand.hbm [shape: f32[2,8,32], index: 2, kind: input, shape index: {}]   ;;  %s2811_s3 = inlined_call_operand.hbm [shape: f32[2,1,1,8], index: 3, kind: input, shape index: {}]   ;;  %s2812_s4 = inlined_call_operand.hbm [shape: f32[2,8,32], index: 4, kind: input, shape index: {}]   ;;  %s2813_s5 = inlined_call_operand.hbm [shape: f32[32,32], index: 5, kind: input, shape index: {}]   ;;  %s2814_s6 = inlined_call_operand.hbm [shape: f32[1,32], index: 6, kind: input, shape index: {}]   ;;  %s2815_s7 = inlined_call_operand.hbm [shape: f32[1,32], index: 7, kind: input, shape index: {}]   ;;  %s2816_s8 = inlined_call_operand.hbm [shape: f32[1,32], index: 8, kind: input, shape index: {}]   ;;  %s2817_s9 = inlined_call_operand.hbm [shape: f32[2,8,32], index: 9, kind: output, shape index: {}]  }
   0x1   :  { %2841 = sst [smem:[#allocation34_spill]] %s2809_s1 }
   0x2   :  { %2842 = sst [smem:[#allocation35_spill]] %s2811_s3 }
   0x3   :  { %2843 = sst [smem:[#allocation36_spill]] %s2813_s5 }
   0x4   :  { %2844 = sst [smem:[#allocation37_spill]] %s2815_s7 }
   0x5   :  { %2845 = sst [smem:[#allocation38_spill]] %s2817_s9 }
   0x6   :  { %14 = vsyncpa [#allocation4], 0 }
   0x7   :  { %16 = vsyncpa [#allocation4 + $0x1], 0 }
   0x8   :  { %17 = vsyncpa [#allocation7], 0 }
   0x9   :  { %19 = vsyncpa [#allocation7 + $0x1], 0 }
   0xa   :  { %20 = vsyncpa [#allocation10], 0 }
   0xb   :  { %22 = vsyncpa [#allocation10 + $0x1], 0 }
   0xc   :  { %23 = vsyncpa [#allocation13], 0 }
   0xd   :  { %24 = vsyncpa [#allocation16], 0 }
   0xe   :  { %25 = vsyncpa [#allocation5], 0 }
   0xf   :  { %27 = vsyncpa [#allocation5 + $0x1], 0  ;;  %s2313_s30 = smov 0   ;;  %s2315_s10 = smov 0  }
  0x10   :  { %s2317_s11 = smov 0   ;;  %s2319_s12 = smov 0  }
  0x11   :  { %s2321_s13 = smov 0   ;;  %s2323_s14 = smov 0  }
  0x12 LB: > { %2846 = sst [smem:[#allocation25_spill]] %s2220_s30  ;;  %s2344_s15 = sadd.s32 4294967295, %s2240_s14   ;;  %s2240_s14 = sphi %s2323_s14, %s33_s14   ;;  %s2236_s13 = sphi %s2321_s13, %s2895_s13   ;;  %s2232_s12 = sphi %s2319_s12, %s2894_s12   ;;  %s2228_s11 = sphi %s2317_s11, %s2893_s11   ;;  %s2224_s10 = sphi %s2315_s10, %s2897_s10   ;;  %s2220_s30 = sphi %s2313_s30, %s2896_s30  }
  0x13   : > { %2847 = sst [smem:[#allocation26_spill]] %s2228_s11  ;;  %s1603_s16 = sadd.s32 4294967294, %s2240_s14  }
  0x14   : > { %2848 = sst [smem:[#allocation27_spill]] %s2232_s12  ;;  %p67_p0 = scmp.ne.s32.totalorder %s2224_s10, %s2220_s30 }
  0x15   : > { %2849 = sst [smem:[#allocation28_spill]] %s2236_s13  ;;  %p2818_p1 = scmp.eq.s32.totalorder %s2344_s15, 0 }
  0x16   : > { %2850 = sst [smem:[#allocation29_spill]] %s2240_s14  ;;  %p289_p3 = scmp.eq.s32.totalorder %s1603_s16, 1 }
  0x17   : > { %p2353_p4 = por %p2818_p1, %p67_p0  ;;  %p1604_p5 = scmp.ge.s32.totalorder %s2240_s14, 1 }
  0x18   : > { %p2358_p6 = por %p289_p3, %p67_p0  ;;  %p296_p7 = scmp.lt.s32.totalorder %s2240_s14, 3 }
  0x19   : > { %s2851_s17 = scalar_select %p2353_p4, 1, 0 }
  0x1a   : > { %s2852_s18 = scalar_select %p2358_p6, 1, 0 }
  0x1b   : > { %p2363_p8 = pnand %p1604_p5, %p296_p7  ;;  %s2242_s20 = smov [#allocation12]  }
  0x1c   : > { %2853 = sst [smem:[#allocation30_spill]] %s2852_s18  ;;  %s308_s21 = sshll.u32 %s2242_s20, 4  ;;  %s2367_s21 = int_to_ptr.vmem [resolvable:$true] %s308_s21 }
  0x1d   : > { %s2854_s19 = scalar_select %p2363_p8, 1, 0 }
  0x1e   : > { %p1756_p9 = pneg %p2363_p8  ;;  %s2243_s23 = smov [#allocation15]  }
  0x1f   : > { %s333_s24 = sshll.u32 %s2243_s23, 4  ;;  %s2856_s5 = sld [smem:[#allocation36_spill]]  ;;  %s2378_s24 = int_to_ptr.vmem [resolvable:$true] %s333_s24 }
  0x20   : > { %p2374_p11 = pnand %p1756_p9, %p2818_p1 }
  0x22   : > { %s2855_s22 = scalar_select %p2374_p11, 1, 0 }
  0x23   : > { %p2388_p13 = pneg %p2374_p11 }
  0x25   : > { %s1880_s27 = scalar_lea.hbm %s2856_s5, 512 }
  0x26   : > { %p1881_p12 = scmp.ne.s32.totalorder %s2856_s5, %s1880_s27  ;;  %p1887_p5 = scmp.lt.u32.totalorder %s1880_s27, %s2856_s5 }
  0x27   : > { %s2857_s16 = scalar_select %p2388_p13, 1, 0 }
  0x28   : > { %p1883_p0 = pnand %p2388_p13, %p1881_p12 }
  0x2a   : > { %p1884_p3 = pneg %p1883_p0 }
  0x2c   : > { %p1889_p7 = pnand %p1887_p5, %p1884_p3 }
  0x2e   : > { %1892 = shalt.err (!%p1889_p7)
}
  0x2f   : > { %s1893_s25 = scalar_lea.vmem %s2367_s21, 512  ;;  %p1901_p2 = scmp.lt.s32.totalorder %s2367_s21, %s2367_s21 }
  0x30   : > { %p1894_p9 = scmp.ne.s32.totalorder %s2367_s21, %s1893_s25  ;;  %p1902_p6 = scmp.lt.s32.totalorder %s1893_s25, %s1893_s25 }
  0x32   : > { %p1896_p10 = pnand %p1894_p9, %p2388_p13  ;;  %p1903_p12 = por %p1902_p6, %p1901_p2 }
  0x34   : > { %p1897_p1 = pneg %p1896_p10 }
  0x36   : > { %p1904_p0 = pnand %p1903_p12, %p1897_p1 }
  0x38   : > { %1907 = shalt.err (!%p1904_p0)
}
  0x39   : > { %s2244_s26 = smov 128   ;;  %s2245_s27 = smov 8  }
  0x3a   : > { %1759 = dma.hbm_to_vmem [thread:$0]  (!%p2374_p11), %s2856_s5, 512, %s2367_s21, [#allocation13], %s2244_s26, %s2244_s26, %s2245_s27  }
  0x3b   : > { %s2858_s7 = sld [smem:[#allocation37_spill]] }
  0x41   : > { %s1908_s18 = scalar_lea.hbm %s2858_s7, 16 }
  0x42   : > { %p1909_p2 = scmp.ne.s32.totalorder %s2858_s7, %s1908_s18  ;;  %p1915_p10 = scmp.lt.u32.totalorder %s1908_s18, %s2858_s7 }
  0x44   : > { %p1911_p1 = pnand %p1909_p2, %p2388_p13 }
  0x46   : > { %p1912_p6 = pneg %p1911_p1 }
  0x48   : > { %p1917_p3 = pnand %p1915_p10, %p1912_p6 }
  0x4a   : > { %1920 = shalt.err (!%p1917_p3)
}
  0x4b   : > { %s1921_s21 = scalar_lea.vmem %s2378_s24, 16  ;;  %s1928_s9 = scalar_lea.vmem %s2378_s24, 32 }
  0x4c   : > { %p1922_p5 = scmp.ne.s32.totalorder %s2378_s24, %s1921_s21  ;;  %p1929_p12 = scmp.lt.s32.totalorder %s2378_s24, %s2378_s24 }
  0x4d   : > { %p1930_p0 = scmp.lt.s32.totalorder %s1928_s9, %s1921_s21 }
  0x4e   : > { %p1924_p7 = pnand %p1922_p5, %p2388_p13 }
  0x4f   : > { %p1931_p2 = por %p1930_p0, %p1929_p12 }
  0x50   : > { %p1925_p9 = pneg %p1924_p7 }
  0x52   : > { %p1932_p1 = pnand %p1931_p2, %p1925_p9 }
  0x54   : > { %1935 = shalt.err (!%p1932_p1)
}
  0x55   : > { %1765 = dma.hbm_to_vmem [thread:$0]  (!%p2374_p11), %s2858_s7, 16, %s2378_s24, [#allocation16]  }
  0x56   : > { %s45_s18 = sadd.s32 1, %s2236_s13  ;;  %s54_s26 = sadd.s32 1, %s2228_s11 }
  0x57   : > { %p47_p6 = scmp.ge.s32.totalorder %s45_s18, 2  ;;  %p61_p10 = scmp.ne.s32.totalorder %s2228_s11, %s2224_s10 }
  0x58   : > { %p62_p3 = scmp.eq.s32.totalorder %s2240_s14, 0  ;;  %p1793_p5 = scmp.lt.s32.totalorder %s2240_s14, 2 }
  0x59   : > { %s2899_s18 = smov (%p47_p6, %s45_s18), 0  ;;  %p2860_p9 = scmp.eq.s32.totalorder %s2344_s15, 1 }
  0x5a   : > { %2859 = sst [smem:[#allocation31_spill]] %s2899_s18  ;;  %p63_p7 = por %p62_p3, %p61_p10 }
  0x5b   : > { %p2443_p12 = por %p2860_p9, %p61_p10  ;;  %s49_s28 = ssub.s32 %s2236_s13, %s2899_s18 }
  0x5c   : > { %s2450_s24 = sand.u32 1, %s2228_s11   ;;  %p52_p0 = scmp.eq.s32.totalorder %s49_s28, 0 }
  0x5d   : > { %s2861_s27 = scalar_select %p2443_p12, 1, 0 }
  0x5e   : > { %s2453_s29 = sshll.u32 %s2450_s24, 3  ;;  %s2456_s20 = sshll.u32 %s2236_s13, 7 }
  0x5f   : > { %2862 = sst [smem:[#allocation32_spill]] %s2861_s27  ;;  %p2458_p2 = pnand %p1793_p5, %p63_p7 }
  0x60   : > { %s2463_s25 = scalar_select %p52_p0, %s2228_s11, %s54_s26  }
  0x61   : > { %s2863_s23 = scalar_select %p2458_p2, 1, 0 }
  0x62   : > { %2864 = sst [smem:[#allocation33_spill]] %s2463_s25  ;;  %s2826_s21 = sand.u32 1, %s2240_s14  }
  0x63   : > { %s2865_s1 = sld [smem:[#allocation34_spill]]  ;;  %s378_s28 = scalar_lea.vmem [#allocation6], %s2453_s29 }
  0x64   : > { %s385_s5 = sshll.u32 %s378_s28, 4  ;;  %s2477_s7 = scalar_lea.sflag [#allocation7], %s2826_s21  ;;  %s2473_s5 = int_to_ptr.vmem [resolvable:$true] %s385_s5 }
  0x65   : > { %p2483_p6 = pneg %p2458_p2 }
  0x67   : > { %s2866_s26 = scalar_select %p2483_p6, 1, 0 }
  0x69   : > { %s2470_s12 = scalar_lea.hbm %s2865_s1, %s2456_s20  ;;  %s1941_s28 = scalar_lea.hbm %s2865_s1, 256 }
  0x6a   : > { %s1936_s18 = scalar_lea.hbm %s2470_s12, 128  ;;  %p1942_p5 = scmp.lt.u32.totalorder %s2470_s12, %s2865_s1 }
  0x6b   : > { %p1937_p1 = scmp.ne.s32.totalorder %s2470_s12, %s1936_s18  ;;  %p1943_p7 = scmp.lt.u32.totalorder %s1941_s28, %s1936_s18 }
  0x6c   : > { %p1945_p0 = scmp.lt.u32.totalorder %s1936_s18, %s2470_s12 }
  0x6d   : > { %p1939_p10 = pnand %p2483_p6, %p1937_p1  ;;  %p1944_p9 = por %p1943_p7, %p1942_p5 }
  0x6f   : > { %p1940_p3 = pneg %p1939_p10  ;;  %p1946_p12 = por %p1945_p0, %p1944_p9 }
  0x71   : > { %p1947_p4 = pnand %p1946_p12, %p1940_p3 }
  0x73   : > { %1950 = shalt.err (!%p1947_p4)
}
  0x74   : > { %s1951_s21 = scalar_lea.vmem %s2473_s5, 128  ;;  %s2246_s9 = smov [#allocation6]  }
  0x75   : > { %p1952_p1 = scmp.ne.s32.totalorder %s2473_s5, %s1951_s21  ;;  %s1956_s30 = sshll.u32 %s2246_s9, 4  ;;  %s1957_s30 = int_to_ptr.vmem [resolvable:$false] %s1956_s30 }
  0x76   : > { %s1958_s11 = scalar_lea.vmem %s1957_s30, 256  ;;  %p1959_p11 = scmp.lt.s32.totalorder %s2473_s5, %s1957_s30 }
  0x77   : > { %p1954_p10 = pnand %p1952_p1, %p2483_p6  ;;  %p1960_p13 = scmp.lt.s32.totalorder %s1958_s11, %s1951_s21 }
  0x79   : > { %p1955_p8 = pneg %p1954_p10  ;;  %p1961_p5 = por %p1960_p13, %p1959_p11 }
  0x7b   : > { %p1962_p7 = pnand %p1961_p5, %p1955_p8 }
  0x7d   : > { %1965 = shalt.err (!%p1962_p7)
}
  0x7e   : > { %1775 = dma.hbm_to_vmem [thread:$0]  (!%p2458_p2), %s2470_s12, 128, %s2473_s5, %s2477_s7  }
  0x7f   : > { %s1616_s18 = sshll.u32 %s2236_s13, 4  ;;  %s2867_s3 = sld [smem:[#allocation35_spill]] }
  0x80   : > { %s413_s21 = scalar_lea.vmem [#allocation9], %s2450_s24  ;;  %s2868_s11 = sand.u32 1, %s2240_s14  }
  0x81   : > { %s420_s30 = sshll.u32 %s413_s21, 4  ;;  %s2516_s1 = scalar_lea.sflag [#allocation10], %s2868_s11  ;;  %s421_s30 = int_to_ptr.vmem [resolvable:$true] %s420_s30 }
  0x85   : > { %s2511_s9 = scalar_lea.hbm %s2867_s3, %s1616_s18  ;;  %s1971_s18 = scalar_lea.hbm %s2867_s3, 32 }
  0x86   : > { %s1966_s27 = scalar_lea.hbm %s2511_s9, 16  ;;  %p1972_p13 = scmp.lt.u32.totalorder %s2511_s9, %s2867_s3 }
  0x87   : > { %p1967_p4 = scmp.ne.s32.totalorder %s2511_s9, %s1966_s27  ;;  %p1973_p12 = scmp.lt.u32.totalorder %s1971_s18, %s1966_s27 }
  0x88   : > { %p1975_p9 = scmp.lt.u32.totalorder %s1966_s27, %s2511_s9 }
  0x89   : > { %p1969_p8 = pnand %p1967_p4, %p2483_p6  ;;  %p1974_p3 = por %p1973_p12, %p1972_p13 }
  0x8b   : > { %p1970_p11 = pneg %p1969_p8  ;;  %p1976_p0 = por %p1975_p9, %p1974_p3 }
  0x8d   : > { %p1977_p1 = pnand %p1976_p0, %p1970_p11 }
  0x8f   : > { %1980 = shalt.err (!%p1977_p1)
}
  0x90   : > { %s1981_s21 = scalar_lea.vmem %s421_s30, 16  ;;  %s2247_s11 = smov [#allocation9]  }
  0x91   : > { %p1982_p10 = scmp.ne.s32.totalorder %s421_s30, %s1981_s21  ;;  %s1986_s13 = sshll.u32 %s2247_s11, 4  ;;  %s1987_s13 = int_to_ptr.vmem [resolvable:$false] %s1986_s13 }
  0x92   : > { %s1988_s5 = scalar_lea.vmem %s1987_s13, 32  ;;  %p1989_p4 = scmp.lt.s32.totalorder %s421_s30, %s1987_s13 }
  0x93   : > { %p1984_p5 = pnand %p1982_p10, %p2483_p6  ;;  %p1990_p8 = scmp.lt.s32.totalorder %s1988_s5, %s1981_s21 }
  0x95   : > { %p1985_p7 = pneg %p1984_p5  ;;  %p1991_p2 = por %p1990_p8, %p1989_p4 }
  0x97   : > { %p1992_p12 = pnand %p1991_p2, %p1985_p7 }
  0x99   : > { %1995 = shalt.err (!%p1992_p12)
}
  0x9a   : > { %p2869_p13 = scmp.ne.s32.totalorder %s2863_s23, 0  ;;  %s2248_s27 = smov [#allocation14]  }
  0x9b   : > { %s322_s12 = sshll.u32 %s2248_s27, 4  ;;  %s2249_s18 = smov [#allocation17]   ;;  %s323_s12 = int_to_ptr.vmem [resolvable:$true] %s322_s12 }
  0x9c   : > { %1781 = dma.hbm_to_vmem [thread:$0]  (!%p2869_p13), %s2511_s9, 16, %s421_s30, %s2516_s1  }
  0x9d   : > { %s344_s25 = sshll.u32 %s2249_s18, 4  ;;  %s1996_s3 = scalar_lea.hbm %s2814_s6, 16  ;;  %s345_s25 = int_to_ptr.vmem [resolvable:$true] %s344_s25 }
  0x9e   : > { %p1997_p2 = scmp.ne.s32.totalorder %s2814_s6, %s1996_s3  ;;  %p2870_p11 = scmp.ne.s32.totalorder %s2857_s16, 0 }
  0x9f   : > { %p2003_p0 = scmp.lt.u32.totalorder %s1996_s3, %s2814_s6 }
  0xa0   : > { %p1999_p3 = pnand %p1997_p2, %p2870_p11 }
  0xa2   : > { %p2000_p9 = pneg %p1999_p3 }
  0xa4   : > { %p2005_p1 = pnand %p2003_p0, %p2000_p9 }
  0xa6   : > { %2008 = shalt.err (!%p2005_p1)
}
  0xa7   : > { %s2009_s9 = scalar_lea.vmem %s323_s12, 16  ;;  %s2016_s30 = scalar_lea.vmem %s323_s12, 32 }
  0xa8   : > { %p2010_p10 = scmp.ne.s32.totalorder %s323_s12, %s2009_s9  ;;  %p2017_p4 = scmp.lt.s32.totalorder %s323_s12, %s323_s12 }
  0xa9   : > { %p2018_p8 = scmp.lt.s32.totalorder %s2016_s30, %s2009_s9 }
  0xaa   : > { %p2012_p5 = pnand %p2010_p10, %p2870_p11 }
  0xab   : > { %p2019_p12 = por %p2018_p8, %p2017_p4 }
  0xac   : > { %p2013_p7 = pneg %p2012_p5 }
  0xae   : > { %p2020_p13 = pnand %p2019_p12, %p2013_p7 }
  0xb0   : > { %2023 = shalt.err (!%p2020_p13)
}
  0xb1   : > { %p2871_p2 = scmp.ne.s32.totalorder %s2855_s22, 0  ;;  %s2024_s28 = scalar_lea.hbm %s2816_s8, 16 }
  0xb2   : > { %p2025_p3 = scmp.ne.s32.totalorder %s2816_s8, %s2024_s28  ;;  %p2031_p13 = scmp.lt.u32.totalorder %s2024_s28, %s2816_s8 }
  0xb3   : > { %1762 = dma.hbm_to_vmem [thread:$0]  (!%p2871_p2), %s2814_s6, 16, %s323_s12, [#allocation13]  }
  0xb4   : > { %p2027_p9 = pnand %p2025_p3, %p2870_p11 }
  0xb6   : > { %p2028_p0 = pneg %p2027_p9 }
  0xb8   : > { %p2033_p1 = pnand %p2031_p13, %p2028_p0 }
  0xba   : > { %2036 = shalt.err (!%p2033_p1)
}
  0xbb   : > { %s2037_s9 = scalar_lea.vmem %s345_s25, 16  ;;  %s2044_s12 = scalar_lea.vmem %s345_s25, 32 }
  0xbc   : > { %p2038_p10 = scmp.ne.s32.totalorder %s345_s25, %s2037_s9  ;;  %p2045_p4 = scmp.lt.s32.totalorder %s345_s25, %s345_s25 }
  0xbd   : > { %p2046_p8 = scmp.lt.s32.totalorder %s2044_s12, %s2037_s9 }
  0xbe   : > { %p2040_p5 = pnand %p2038_p10, %p2870_p11 }
  0xbf   : > { %p2047_p12 = por %p2046_p8, %p2045_p4 }
  0xc0   : > { %p2041_p7 = pneg %p2040_p5 }
  0xc2   : > { %p2048_p6 = pnand %p2047_p12, %p2041_p7 }
  0xc4   : > { %2051 = shalt.err (!%p2048_p6)
}
  0xc5   : > { %1768 = dma.hbm_to_vmem [thread:$0]  (!%p2871_p2), %s2816_s8, 16, %s345_s25, [#allocation16]  }
  0xc6   : > { %s2576_s3 = scalar_lea.hbm %s2808_s0, %s2456_s20  ;;  %s359_s14 = scalar_lea.vmem [#allocation3], %s2453_s29 }
  0xc7   : > { %s367_s22 = sshll.u32 %s359_s14, 4  ;;  %s2585_s13 = scalar_lea.hbm %s2810_s2, %s2456_s20  ;;  %s2579_s22 = int_to_ptr.vmem [resolvable:$true] %s367_s22 }
  0xc8   : > { %s356_s21 = scalar_lea.sflag [#allocation4], %s2450_s24  ;;  %s2052_s25 = scalar_lea.hbm %s2576_s3, 128 }
  0xc9   : > { %p2053_p6 = scmp.ne.s32.totalorder %s2576_s3, %s2052_s25  ;;  %p2872_p11 = scmp.ne.s32.totalorder %s2866_s26, 0 }
  0xca   : > { %s2057_s12 = scalar_lea.hbm %s2808_s0, 256  ;;  %p2058_p9 = scmp.lt.u32.totalorder %s2576_s3, %s2808_s0 }
  0xcb   : > { %p2055_p2 = pnand %p2053_p6, %p2872_p11  ;;  %p2059_p0 = scmp.lt.u32.totalorder %s2057_s12, %s2052_s25 }
  0xcc   : > { %p2061_p1 = scmp.lt.u32.totalorder %s2052_s25, %s2576_s3 }
  0xcd   : > { %p2056_p3 = pneg %p2055_p2  ;;  %p2060_p13 = por %p2059_p0, %p2058_p9 }
  0xcf   : > { %p2062_p10 = por %p2061_p1, %p2060_p13 }
  0xd1   : > { %p2063_p5 = pnand %p2062_p10, %p2056_p3 }
  0xd3   : > { %2066 = shalt.err (!%p2063_p5)
}
  0xd4   : > { %s2067_s24 = scalar_lea.vmem %s2579_s22, 128  ;;  %s2250_s16 = smov [#allocation3]  }
  0xd5   : > { %p2068_p7 = scmp.ne.s32.totalorder %s2579_s22, %s2067_s24  ;;  %s2072_s18 = sshll.u32 %s2250_s16, 4  ;;  %s2073_s18 = int_to_ptr.vmem [resolvable:$false] %s2072_s18 }
  0xd6   : > { %s2074_s14 = scalar_lea.vmem %s2073_s18, 256  ;;  %p2075_p12 = scmp.lt.s32.totalorder %s2579_s22, %s2073_s18 }
  0xd7   : > { %p2070_p4 = pnand %p2068_p7, %p2872_p11  ;;  %p2076_p6 = scmp.lt.s32.totalorder %s2074_s14, %s2067_s24 }
  0xd9   : > { %p2071_p8 = pneg %p2070_p4  ;;  %p2077_p2 = por %p2076_p6, %p2075_p12 }
  0xdb   : > { %p2078_p9 = pnand %p2077_p2, %p2071_p8 }
  0xdd   : > { %2081 = shalt.err (!%p2078_p9)
}
  0xde   : > { %p2873_p3 = scmp.ne.s32.totalorder %s2863_s23, 0  ;;  %s396_s28 = scalar_lea.vmem [#allocation8], %s2453_s29 }
  0xdf   : > { %s403_s11 = sshll.u32 %s396_s28, 4  ;;  %s2614_s9 = scalar_lea.hbm %s2812_s4, %s2456_s20  ;;  %s404_s11 = int_to_ptr.vmem [resolvable:$true] %s403_s11 }
  0xe0   : > { %1772 = dma.hbm_to_vmem [thread:$0]  (!%p2873_p3), %s2576_s3, 128, %s2579_s22, %s356_s21  }
  0xe1   : > { %s2082_s12 = scalar_lea.hbm %s2585_s13, 128  ;;  %s2087_s24 = scalar_lea.hbm %s2810_s2, 256 }
  0xe2   : > { %p2083_p0 = scmp.ne.s32.totalorder %s2585_s13, %s2082_s12  ;;  %p2088_p10 = scmp.lt.u32.totalorder %s2585_s13, %s2810_s2 }
  0xe3   : > { %p2089_p5 = scmp.lt.u32.totalorder %s2087_s24, %s2082_s12  ;;  %p2091_p4 = scmp.lt.u32.totalorder %s2082_s12, %s2585_s13 }
  0xe4   : > { %p2085_p13 = pnand %p2083_p0, %p2872_p11 }
  0xe5   : > { %p2090_p7 = por %p2089_p5, %p2088_p10 }
  0xe6   : > { %p2086_p1 = pneg %p2085_p13 }
  0xe7   : > { %p2092_p8 = por %p2091_p4, %p2090_p7 }
  0xe9   : > { %p2093_p12 = pnand %p2092_p8, %p2086_p1 }
  0xeb   : > { %2096 = shalt.err (!%p2093_p12)
}
  0xec   : > { %s2097_s20 = scalar_lea.vmem %s404_s11, 128  ;;  %s2251_s3 = smov [#allocation8]  }
  0xed   : > { %p2098_p6 = scmp.ne.s32.totalorder %s404_s11, %s2097_s20  ;;  %s2102_s22 = sshll.u32 %s2251_s3, 4  ;;  %s2103_s22 = int_to_ptr.vmem [resolvable:$false] %s2102_s22 }
  0xee   : > { %s2104_s21 = scalar_lea.vmem %s2103_s22, 256  ;;  %p2105_p0 = scmp.lt.s32.totalorder %s404_s11, %s2103_s22 }
  0xef   : > { %p2100_p2 = pnand %p2098_p6, %p2872_p11  ;;  %p2106_p13 = scmp.lt.s32.totalorder %s2104_s21, %s2097_s20 }
  0xf1   : > { %p2101_p9 = pneg %p2100_p2  ;;  %p2107_p3 = por %p2106_p13, %p2105_p0 }
  0xf3   : > { %p2108_p5 = pnand %p2107_p3, %p2101_p9 }
  0xf5   : > { %2111 = shalt.err (!%p2108_p5)
}
  0xf6   : > { %p2874_p10 = scmp.ne.s32.totalorder %s2863_s23, 0  ;;  %s431_s14 = scalar_lea.vmem [#allocation11], %s2453_s29 }
  0xf7   : > { %s439_s28 = sshll.u32 %s431_s14, 4  ;;  %s2112_s25 = scalar_lea.hbm %s2614_s9, 128  ;;  %s440_s28 = int_to_ptr.vmem [resolvable:$true] %s439_s28 }
  0xf8   : > { %1778 = dma.hbm_to_vmem [thread:$0]  (!%p2874_p10), %s2585_s13, 128, %s404_s11, %s2477_s7  }
  0xf9   : > { %p2113_p1 = scmp.ne.s32.totalorder %s2614_s9, %s2112_s25  ;;  %s2117_s30 = scalar_lea.hbm %s2812_s4, 256 }
  0xfa   : > { %p2118_p4 = scmp.lt.u32.totalorder %s2614_s9, %s2812_s4  ;;  %p2119_p8 = scmp.lt.u32.totalorder %s2117_s30, %s2112_s25 }
  0xfb   : > { %p2115_p7 = pnand %p2113_p1, %p2872_p11  ;;  %p2121_p6 = scmp.lt.u32.totalorder %s2112_s25, %s2614_s9 }
  0xfc   : > { %p2120_p12 = por %p2119_p8, %p2118_p4 }
  0xfd   : > { %p2116_p3 = pneg %p2115_p7 }
  0xfe   : > { %p2122_p2 = por %p2121_p6, %p2120_p12 }
 0x100   : > { %p2123_p9 = pnand %p2122_p2, %p2116_p3 }
 0x102   : > { %2126 = shalt.err (!%p2123_p9)
}
 0x103   : > { %s2127_s7 = scalar_lea.vmem %s440_s28, 128  ;;  %s2252_s29 = smov [#allocation11]  }
 0x104   : > { %p2128_p0 = scmp.ne.s32.totalorder %s440_s28, %s2127_s7  ;;  %s2132_s13 = sshll.u32 %s2252_s29, 4  ;;  %s2133_s13 = int_to_ptr.vmem [resolvable:$false] %s2132_s13 }
 0x105   : > { %s2134_s11 = scalar_lea.vmem %s2133_s13, 256  ;;  %p2135_p1 = scmp.lt.s32.totalorder %s440_s28, %s2133_s13 }
 0x106   : > { %p2130_p13 = pnand %p2128_p0, %p2872_p11  ;;  %p2136_p7 = scmp.lt.s32.totalorder %s2134_s11, %s2127_s7 }
 0x108   : > { %p2131_p5 = pneg %p2130_p13  ;;  %p2137_p10 = por %p2136_p7, %p2135_p1 }
 0x10a   : > { %p2138_p4 = pnand %p2137_p10, %p2131_p5 }
 0x10c   : > { %2141 = shalt.err (!%p2138_p4)
}
 0x10d   : > { %p2875_p8 = scmp.ne.s32.totalorder %s2863_s23, 0  ;;  %p2876_p3 = scmp.ne.s32.totalorder %s2854_s19, 0 }
 0x10e   : > { %s2656_s26 = sand.u32 (!%p2876_p3), 1, %s2224_s10   ;;  %p2877_p11 = scmp.ne.s32.totalorder (!%p2876_p3), %s2851_s17, 0 }
 0x10f   : > { %1784 = dma.hbm_to_vmem [thread:$0]  (!%p2875_p8), %s2614_s9, 128, %s440_s28, %s2516_s1  }
 0x110   : > { %448 = sbr.rel (%p2876_p3) target bundleno = 1828 (0x724), region = 56  ;;  %s2659_s16 = sshll.u32 (!%p2876_p3), %s2656_s26, 3 }
 0x111   : > { %s451_s18 = scalar_lea.sflag (!%p2876_p3), [#allocation4], %s2656_s26  ;;  %s454_s20 = scalar_lea.vmem (!%p2876_p3), [#allocation3], %s2659_s16 }
 0x117   : > { %2195 = dma.done.wait (%p2877_p11), %s451_s18, 128  }
 0x118   : > { %2197 = vsyncadd (%p2877_p11), %s451_s18, 4294967168  ;;  %s459_s1 = sand.u32 1, %s2344_s15   ;;  %s463_s23 = scalar_lea.vmem [#allocation6], %s2659_s16 }
 0x119   : > { %s460_s19 = scalar_lea.sflag [#allocation7], %s459_s1 }
 0x11a   : > { %2199 = dma.done.wait (%p2877_p11), %s460_s19, 256  }
 0x11b   : > { %2201 = vsyncadd (%p2877_p11), %s460_s19, 4294967040  ;;  %s472_s9 = scalar_lea.vmem [#allocation8], %s2659_s16  ;;  %s478_s3 = scalar_lea.sflag [#allocation10], %s459_s1 }
 0x11c   : > { %s480_s22 = scalar_lea.vmem [#allocation9], %s2656_s26 }
 0x11d   : > { %2203 = dma.done.wait (%p2877_p11), %s478_s3, 144  }
 0x11e   : > { %2205 = vsyncadd (%p2877_p11), %s478_s3, 4294967152  ;;  %s489_s21 = scalar_lea.vmem [#allocation11], %s2659_s16  ;;  %p2878_p10 = scmp.eq.s32.totalorder %s2344_s15, 0 }
 0x120   : > { %2207 = dma.done.wait (%p2878_p10), [#allocation13], 528   ;;  %p2879_p12 = pmov %p2878_p10 }
 0x121   : > { %p2880_p6 = pmov %p2878_p10 }
 0x122   : > { %2209 = vsyncadd (%p2879_p12), [#allocation13], 4294966768 }
 0x123   : > { %2211 = dma.done.wait (%p2880_p6), [#allocation16], 32   ;;  %p2881_p2 = pmov %p2880_p6 }
 0x124   : > { %v2253_v0 = vmov 0.0   ;;  %vm2254_vm0 = vmmov 0   ;;  %vm570_vm1 = vcmask 64512   ;;  %v734_v1 = vld [vmem:[%s463_s23] sm:$0xff]  ;;  %v566_v2 = vld [vmem:[%s454_s20] sm:$0xff]  ;;  %s2255_s17 = smov 120  }
 0x125   : > { %2213 = vsyncadd (%p2881_p2), [#allocation16], 4294967264  ;;  %1671 = vmatprep.subr.mxu0 %v2253_v0  ;;  %1673 = vmatprep.mubr.msk.f32.mxu0 %vm2254_vm0, %v2253_v0  ;;  %v567_v3 = vmul.f32 0.35355338, %v566_v2  ;;  %s2256_s15 = smov 112   ;;  %s2257_s14 = smov 104  }
 0x126   : > { %1681 = vmatprep.subr.mxu1 %v2253_v0  ;;  %1683 = vmatprep.mubr.msk.f32.mxu1 %vm2254_vm0, %v2253_v0  ;;  %v1629_v10 = vld [vmem:[%s480_s22] ss:$0 sm:$0xff]  ;;  %v735_v12 = vld [vmem:[%s472_s9] sm:$0xff]  ;;  %s2259_s28 = smov 8   ;;  %s2260_s25 = smov 16   ;;  %vm908_vm2 = vcmask 130112  }
 0x127   : > { %740 = vrot.lane.b32.xlu0 %v734_v1, %s2255_s17  ;;  %1672 = vmatpush3.xpose.msk.msra.mxu0 %vm570_vm1, %v734_v1  ;;  %v1267_v2 = vld [vmem:[#allocation12] sm:$0xff]  ;;  %s2261_s5 = smov 24   ;;  %vm1086_vm3 = vcmask 195712   ;;  %vm1264_vm4 = vcmask 261312   ;;  %vm1278_vm5 = vcmask 261120   ;;  %s2882_s12 = sld [smem:[#allocation27_spill]] }
 0x128   : > { %918 = vrot.lane.b32.xlu1 %v734_v1, %s2256_s15  ;;  %1676 = vmatprep.subr.mxu0 %v2253_v0  ;;  %s2883_s30 = sld [smem:[#allocation32_spill]]  ;;  %s558_s24 = scalar_lea.vmem [#allocation18], %s2659_s16 }
 0x129   : > { %s1400_s7 = sshll.u32 %s558_s24, 4  ;;  %s2884_s11 = sld [smem:[#allocation38_spill]]  ;;  %s2760_s7 = int_to_ptr.vmem [resolvable:$true] %s1400_s7 }
 0x12a   : > { %1674 = vmatmul.mubr.msk.f32.vlgmr.msra.gmra.mrb[0].mxu0 %vm570_vm1, %v567_v3  ;;  %s1386_s1 = scalar_lea.sflag [#allocation5], %s2656_s26  ;;  %s2142_s19 = scalar_lea.vmem %s2760_s7, 128 }
 0x12b   : > { %737 = vrot.lane.b32.xlu0 %v567_v3, %s2255_s17  ;;  %1678 = vmatprep.mubr.msk.f32.mxu0 %vm2254_vm0, %v2253_v0  ;;  %p2143_p9 = scmp.ne.s32.totalorder %s2760_s7, %s2142_s19  ;;  %s2262_s16 = smov [#allocation18]  }
 0x12c   : > { %915 = vrot.lane.b32.xlu1 %v567_v3, %s2256_s15  ;;  %1677 = vmatpush3.msra.mxu0 %v735_v12  ;;  %s2146_s23 = sshll.u32 %s2262_s16, 4  ;;  %s2147_s23 = int_to_ptr.vmem [resolvable:$false] %s2146_s23 }
 0x12d   : > { %1686 = vmatprep.subr.mxu0 %v2253_v0  ;;  %s1647_s27 = sshll.u32 %s2882_s12, 7  ;;  %s2148_s9 = scalar_lea.vmem %s2147_s23, 256 }
 0x12e   : > { %p2886_p0 = scmp.ne.s32.totalorder %s2883_s30, 0  ;;  %p2149_p1 = scmp.lt.s32.totalorder %s2760_s7, %s2147_s23 }
 0x12f   : > { %1096 = vrot.lane.b32.xlu0 %v734_v1, %s2257_s14  ;;  %s2885_s18 = smov %s2884_s11  ;;  %s2758_s20 = scalar_lea.hbm %s2884_s11, %s1647_s27 }
 0x130   : > { %1093 = vrot.lane.b32.xlu1 %v567_v3, %s2257_s14  ;;  %v1268_v3 = vld [vmem:[#allocation12 + $0x8] sm:$0xff]  ;;  %p2144_p13 = pnand %p2143_p9, %p2886_p0  ;;  %p2150_p7 = scmp.lt.s32.totalorder %s2148_s9, %s2142_s19 }
 0x132   : > { %p2145_p5 = pneg %p2144_p13  ;;  %p2151_p4 = por %p2150_p7, %p2149_p1 }
 0x134   : > { %p2152_p8 = pnand %p2151_p4, %p2145_p5 }
 0x199   : > { %v741_v4 = vpop.permute.xlu0 %740 }
 0x19a   : > { %1682 = vmatpush3.xpose.msk.msra.mxu1 %vm570_vm1, %v741_v4  ;;  %v919_v5 = vpop.permute.xlu1 %918  ;;  %v1723_v4 = vpack.c.bf16 %v1268_v3, %v1267_v2 }
 0x19b   : > { %1691 = vmatprep.subr.mxu1 %v2253_v0 }
 0x19d   : > { %v738_v6 = vpop.permute.xlu0 %737 }
 0x19e   : > { %1684 = vmatmul.mubr.msk.f32.vlgmr.msra.gmra.mrb[0].mxu1 %vm570_vm1, %v738_v6  ;;  %v916_v7 = vpop.permute.xlu1 %915  ;;  %v1270_v6 = vld [vmem:[#allocation12 + $0x18] sm:$0xff] }
 0x19f   : > { %1692 = vmatpush3.xpose.msk.msra.mxu1 %vm570_vm1, %v919_v5  ;;  %1693 = vmatprep.mubr.msk.f32.mxu1 %vm2254_vm0, %v2253_v0  ;;  %v1269_v5 = vld [vmem:[#allocation12 + $0x10] sm:$0xff] }
 0x1a0   : > { %1701 = vmatprep.subr.mxu1 %v2253_v0 }
 0x1a1   : > { %v1097_v8 = vpop.permute.xlu0 %1096 }
 0x1a2   : > { %1694 = vmatmul.mubr.msk.f32.vlgmr.msra.gmra.mrb[2].mxu1 %vm570_vm1, %v916_v7  ;;  %v1094_v9 = vpop.permute.xlu1 %1093  ;;  %v2258_v7 = vmov 0.0|0.0  }
 0x1a3   : > { %1702 = vmatpush3.xpose.msk.msra.mxu1 %vm570_vm1, %v1097_v8  ;;  %1703 = vmatprep.mubr.msk.f32.mxu1 %vm2254_vm0, %v2253_v0  ;;  %v1726_v8 = vpack.c.bf16 %v1270_v6, %v1269_v5 }
 0x1a4   : > { %1722 = vmatprep.subr.bf16.mxu1 %v2258_v7 }
 0x1a6   : > { %1704 = vmatmul.mubr.msk.f32.vlgmr.msra.gmra.mrb[4].mxu1 %vm570_vm1, %v1094_v9 }
 0x1a7   : > { %1719 = vmatprep.mubr.msk.f32.mxu1 %vm2254_vm0, %v2253_v0  ;;  %1724 = vmatpush3.bf16.msra.mxu1 %v1723_v4 }
 0x1a8   : > { %1725 = vmatprep.subr.bf16.mxu1 %v2258_v7 }
 0x1ab   : > { %1727 = vmatpush3.bf16.msra.mxu1 %v1726_v8 }
 0x1fd   : > { %v643_v11 = vpop.f32.mrb[0].mxu0 }
 0x1fe   : > { %v644_v13 = vadd.f32 %v1629_v10, %v643_v11  ;;  %v1675_v14 = vpop.f32.mrb[1].mxu0 }
 0x200   : > { %v647_v15 = vsel %vm570_vm1, %v644_v13, -inf }
 0x201   : > { %648 = vmax.xlane.f32.xlu0 %v647_v15 }
 0x271   : > { %v812_v16 = vpop.f32.mrb[0].mxu1 }
 0x272   : > { %v813_v17 = vadd.f32 %v1629_v10, %v812_v16  ;;  %v1685_v18 = vpop.f32.mrb[1].mxu1 }
 0x273   : > { %v1642_v18 = vld [vmem:[#allocation14] ss:$0 sm:$0xff] }
 0x274   : > { %v816_v19 = vsel %vm570_vm1, %v813_v17, -inf }
 0x275   : > { %v990_v20 = vpop.f32.mrb[2].mxu1  ;;  %817 = vmax.xlane.f32.xlu1 %v816_v19 }
 0x276   : > { %v991_v21 = vadd.f32 %v1629_v10, %v990_v20  ;;  %v1695_v22 = vpop.f32.mrb[3].mxu1  ;;  %v1352_v20 = vld [vmem:[%s489_s21] sm:$0xff] }
 0x278   : > { %v994_v23 = vsel %vm570_vm1, %v991_v21, -inf }
 0x279   : > { %v1168_v24 = vpop.f32.mrb[4].mxu1  ;;  %995 = vmax.xlane.f32.xlu0 %v994_v23 }
 0x27a   : > { %v1169_v25 = vadd.f32 %v1629_v10, %v1168_v24  ;;  %v1705_v26 = vpop.f32.mrb[5].mxu1 }
 0x27c   : > { %v1172_v27 = vsel %vm570_vm1, %v1169_v25, -inf }
 0x27d   : > { %1173 = vmax.xlane.f32.xlu0 %v1172_v27 }
 0x286   : > { %828 = vrot.lane.b32.xlu1 %v735_v12, %s2255_s17 }
 0x28e   : > { %v649_v28 = vpop.xlane.xlu0 %648 }
 0x28f   : > { %v650_v29 = vsub.f32 %v644_v13, %v649_v28 }
 0x291   : > { %v651_v30 = vmul.f32 1.442695, %v650_v29 }
 0x293   : > { %1862 = vpow2.f32 %v651_v30 }
 0x29d   : > { %v1863_v31 = vpop.eup %1862 }
 0x29e   : > { %v653_v32 = vsel %vm570_vm1, %v1863_v31, 0.0 }
 0x2aa   : > { %654 = vadd.xlane.f32.xlu1 %v653_v32 }
 0x302   : > { %v818_v33 = vpop.xlane.xlu1 %817 }
 0x303   : > { %v819_v34 = vsub.f32 %v813_v17, %v818_v33 }
 0x305   : > { %v820_v35 = vmul.f32 1.442695, %v819_v34  ;;  %v1644_v34 = vld [vmem:[#allocation15] ss:$0 sm:$0xff] }
 0x306   : > { %v996_v36 = vpop.xlane.xlu0 %995  ;;  %v829_v48 = vpop.permute.xlu1 %828 }
 0x307   : > { %1864 = vpow2.f32 %v820_v35  ;;  %v997_v37 = vsub.f32 %v991_v21, %v996_v36  ;;  %v1645_v36 = vld [vmem:[#allocation17] ss:$0 sm:$0xff] }
 0x309   : > { %v998_v38 = vmul.f32 1.442695, %v997_v37 }
 0x30a   : > { %v1174_v39 = vpop.xlane.xlu0 %1173 }
 0x30b   : > { %1866 = vpow2.f32 %v998_v38  ;;  %v1175_v40 = vsub.f32 %v1169_v25, %v1174_v39 }
 0x30d   : > { %v1176_v41 = vmul.f32 1.442695, %v1175_v40 }
 0x30f   : > { %1868 = vpow2.f32 %v1176_v41 }
 0x311   : > { %v1865_v42 = vpop.eup %1864 }
 0x312   : > { %v822_v43 = vsel %vm570_vm1, %v1865_v42, 0.0 }
 0x313   : > { %823 = vadd.xlane.f32.xlu0 %v822_v43 }
 0x315   : > { %v1867_v44 = vpop.eup %1866 }
 0x316   : > { %v1000_v45 = vsel %vm570_vm1, %v1867_v44, 0.0 }
 0x317   : > { %1001 = vadd.xlane.f32.xlu1 %v1000_v45 }
 0x319   : > { %v1869_v46 = vpop.eup %1868 }
 0x31a   : > { %v1178_v47 = vsel %vm570_vm1, %v1869_v46, 0.0 }
 0x31b   : > { %1179 = vadd.xlane.f32.xlu0 %v1178_v47 }
 0x328   : > { %1184 = vrot.lane.b32.xlu1 %v735_v12, %s2257_s14 }
 0x331   : > { %1006 = vrot.lane.b32.xlu0 %v735_v12, %s2256_s15 }
 0x337   : > { %v655_v49 = vpop.xlane.xlu1 %654 }
 0x338   : > { %1870 = vrcp.f32 %v655_v49 }
 0x342   : > { %v1871_v50 = vpop.eup %1870 }
 0x343   : > { %v657_v51 = vmul.f32 %v1871_v50, %v1863_v31 }
 0x345   : > { %1679 = vmatmul.mubr.msk.f32.vlgmr.msra.gmra.mrb[2].mxu0 %vm570_vm1, %v657_v51 }
 0x346   : > { %1687 = vmatpush3.msra.mxu0 %v829_v48  ;;  %1688 = vmatprep.mubr.msk.f32.mxu0 %vm2254_vm0, %v2253_v0 }
 0x347   : > { %1696 = vmatprep.subr.mxu0 %v2253_v0 }
 0x3a0   : > { %v824_v52 = vpop.xlane.xlu0 %823 }
 0x3a1   : > { %1872 = vrcp.f32 %v824_v52 }
 0x3a4   : > { %v1002_v53 = vpop.xlane.xlu1 %1001 }
 0x3a5   : > { %1874 = vrcp.f32 %v1002_v53 }
 0x3a8   : > { %v1180_v54 = vpop.xlane.xlu0 %1179  ;;  %v1185_v60 = vpop.permute.xlu1 %1184 }
 0x3a9   : > { %1876 = vrcp.f32 %v1180_v54 }
 0x3ab   : > { %v1873_v55 = vpop.eup %1872 }
 0x3ac   : > { %v826_v56 = vmul.f32 %v1873_v55, %v1865_v42  ;;  %v1007_v57 = vpop.permute.xlu0 %1006 }
 0x3ae   : > { %1689 = vmatmul.mubr.msk.f32.vlgmr.msra.gmra.mrb[4].mxu0 %vm570_vm1, %v826_v56 }
 0x3af   : > { %v1875_v58 = vpop.eup %1874  ;;  %1697 = vmatpush3.msra.mxu0 %v1007_v57  ;;  %1698 = vmatprep.mubr.msk.f32.mxu0 %vm2254_vm0, %v2253_v0 }
 0x3b0   : > { %v1004_v59 = vmul.f32 %v1875_v58, %v1867_v44  ;;  %1706 = vmatprep.subr.mxu0 %v2253_v0 }
 0x3b2   : > { %1699 = vmatmul.mubr.msk.f32.vlgmr.msra.gmra.mrb[6].mxu0 %vm570_vm1, %v1004_v59 }
 0x3b3   : > { %v1877_v61 = vpop.eup %1876  ;;  %1707 = vmatpush3.msra.mxu0 %v1185_v60  ;;  %1708 = vmatprep.mubr.msk.f32.mxu0 %vm2254_vm0, %v2253_v0 }
 0x3b4   : > { %v1182_v62 = vmul.f32 %v1877_v61, %v1869_v46 }
 0x3b6   : > { %1709 = vmatmul.mubr.msk.f32.vlgmr.msra.gmra.mrb[8].mxu0 %vm570_vm1, %v1182_v62 }
 0x418   : > { %v727_v63 = vpop.f32.mrb[2].mxu0 }
 0x419   : > { %731 = vst.msk [vmem:[#allocation2] sm:$0xff] %vm570_vm1, %v727_v63  ;;  %v1680_v1 = vpop.f32.mrb[3].mxu0 }
 0x481   : > { %v900_v9 = vpop.f32.mrb[4].mxu0 }
 0x482   : > { %905 = vrot.lane.b32.xlu1 %v900_v9, %s2259_s28  ;;  %v1690_v0 = vpop.f32.mrb[5].mxu0 }
 0x485   : > { %v1078_v10 = vpop.f32.mrb[6].mxu0 }
 0x486   : > { %1083 = vrot.lane.b32.xlu0 %v1078_v10, %s2260_s25  ;;  %v1700_v11 = vpop.f32.mrb[7].mxu0 }
 0x489   : > { %v1256_v12 = vpop.f32.mrb[8].mxu0 }
 0x48a   : > { %1261 = vrot.lane.b32.xlu1 %v1256_v12, %s2261_s5  ;;  %v1710_v13 = vpop.f32.mrb[9].mxu0 }
 0x4f4   : > { %v906_v14 = vpop.permute.xlu1 %905 }
 0x4f5   : > { %909 = vst.msk [vmem:[#allocation2] sm:$0xff] %vm908_vm2, %v906_v14 }
 0x4f8   : > { %v1084_v15 = vpop.permute.xlu0 %1083 }
 0x4f9   : > { %1087 = vst.msk [vmem:[#allocation2] sm:$0xff] %vm1086_vm3, %v1084_v15 }
 0x4fc   : > { %v1262_v16 = vpop.permute.xlu1 %1261 }
 0x4fd   : > { %1265 = vst.msk [vmem:[#allocation2] sm:$0xff] %vm1264_vm4, %v1262_v16 }
 0x504   : > { %v1266_v17 = vld [vmem:[#allocation2] sm:$0xff] }
 0x505   : > { %1720 = vmatmul.mubr.msk.f32.vlgmr.msra.gmra.mrb[6].mxu1 %vm1278_vm5, %v1266_v17 }
 0x5d8   : > { %v1348_v19 = vpop.f32.mrb[6].mxu1 }
 0x5d9   : > { %v1349_v21 = vadd.f32 %v1642_v18, %v1348_v19  ;;  %v1721_v22 = vpop.f32.mrb[7].mxu1 }
 0x5db   : > { %v1353_v23 = vadd.f32 %v1352_v20, %v1349_v21 }
 0x5dd   : > { %v1354_v24 = vsel %vm1278_vm5, %v1353_v23, 0.0 }
 0x5de   : > { %1355 = vadd.xlane.f32.xlu0 %v1354_v24 }
 0x66b   : > { %v1356_v25 = vpop.xlane.xlu0 %1355 }
 0x66c   : > { %v1358_v26 = vmul.f32 0.03125, %v1356_v25 }
 0x66e   : > { %v1359_v27 = vsub.f32 %v1353_v23, %v1358_v26 }
 0x670   : > { %v1360_v28 = vmul.f32 %v1359_v27, %v1359_v27 }
 0x672   : > { %v1361_v29 = vsel %vm1278_vm5, %v1360_v28, 0.0 }
 0x673   : > { %1362 = vadd.xlane.f32.xlu1 %v1361_v29 }
 0x700   : > { %v1363_v30 = vpop.xlane.xlu1 %1362 }
 0x701   : > { %v1364_v31 = vmul.f32 0.03125, %v1363_v30 }
 0x703   : > { %v1365_v32 = vadd.f32 1e-12, %v1364_v31 }
 0x705   : > { %1878 = vrsqrt.f32 %v1365_v32 }
 0x70f   : > { %v1879_v33 = vpop.eup %1878 }
 0x710   : > { %v1367_v35 = vmul.f32 %v1879_v33, %v1359_v27 }
 0x712   : > { %v1375_v37 = vmul.f32 %v1644_v34, %v1367_v35 }
 0x714   : > { %v1383_v38 = vadd.f32 %v1645_v36, %v1375_v37 }
 0x716   : > { %1384 = vst.msk [vmem:[%s558_s24] sm:$0xff] %vm1278_vm5, %v1383_v38 }
 0x717   : > { %2155 = shalt.err (!%p2152_p8)
}
 0x718   : > { %s2156_s26 = scalar_lea.hbm %s2758_s20, 128  ;;  %s2160_s21 = scalar_lea.hbm %s2885_s18, 256 }
 0x719   : > { %p2157_p3 = scmp.ne.s32.totalorder %s2758_s20, %s2156_s26  ;;  %p2161_p12 = scmp.lt.u32.totalorder %s2758_s20, %s2885_s18 }
 0x71a   : > { %p2162_p6 = scmp.lt.u32.totalorder %s2160_s21, %s2156_s26  ;;  %p2164_p9 = scmp.lt.u32.totalorder %s2156_s26, %s2758_s20 }
 0x71b   : > { %p2158_p11 = pnand %p2157_p3, %p2886_p0 }
 0x71c   : > { %p2163_p2 = por %p2162_p6, %p2161_p12 }
 0x71d   : > { %p2159_p10 = pneg %p2158_p11 }
 0x71e   : > { %p2165_p13 = por %p2164_p9, %p2163_p2 }
 0x720   : > { %p2166_p5 = pnand %p2165_p13, %p2159_p10 }
 0x722   : > { %2169 = shalt.err (!%p2166_p5)
}
 0x723   : > { %1754 = dma.vmem_to_hbm [thread:$0]  (%p2886_p0), %s2760_s7, 128, %s2758_s20, %s1386_s1  }
 0x724 PF: > { %s2887_s14 = sld [smem:[#allocation25_spill]]  ;;  %s2888_s28 = sld [smem:[#allocation30_spill]] }
 0x725   : > { %s2889_s25 = sld [smem:[#allocation29_spill]] }
 0x72a   : > { %s1412_s5 = sand.u32 1, %s2887_s14   ;;  %p2890_p1 = scmp.ne.s32.totalorder %s2888_s28, 0 }
 0x72b   : > { %p2891_p7 = scmp.ge.s32.totalorder %s2889_s25, 2  ;;  %s1413_s12 = scalar_lea.sflag [#allocation5], %s1412_s5 }
 0x72d   : > { %p1786_p4 = pnand %p2891_p7, %p2890_p1 }
 0x72f   : > { %2215 = dma.done.wait (!%p1786_p4), %s1413_s12, 128  }
 0x730   : > { %2217 = vsyncadd (!%p1786_p4), %s1413_s12, 4294967168  ;;  %s33_s14 = sadd.s32 1, %s2889_s25   ;;  %s2892_s27 = sld [smem:[#allocation26_spill]] }
 0x731   : > { %p30_p8 = scmp.ge.s32.totalorder %s33_s14, 4   ;;  %s2893_s11 = sld [smem:[#allocation33_spill]] }
 0x732   : > { %s2894_s12 = sld [smem:[#allocation28_spill]]  ;;  %s2895_s13 = sld [smem:[#allocation31_spill]] }
 0x733   : > { %s2896_s30 = smov %s2224_s10  ;;  %32 = sbr.rel (!%p30_p8) target bundleno = 18 (0x12), region = 165 }
 0x736   : > { %s2897_s10 = smov %s2892_s27 }
 0x73a   :  { %1418 = vsyncpa [#allocation4], 1 }
 0x73b   :  { %1420 = vsyncpa [#allocation4 + $0x1], 1 }
 0x73c   :  { %1421 = vsyncpa [#allocation7], 1 }
 0x73d   :  { %1423 = vsyncpa [#allocation7 + $0x1], 1 }
 0x73e   :  { %1424 = vsyncpa [#allocation10], 1 }
 0x73f   :  { %1426 = vsyncpa [#allocation10 + $0x1], 1 }
 0x740   :  { %1427 = vsyncpa [#allocation13], 1 }
 0x741   :  { %1428 = vsyncpa [#allocation16], 1 }
 0x742   :  { %1429 = vsyncpa [#allocation5], 1 }
 0x743   :  { %1431 = vsyncpa [#allocation5 + $0x1], 1 }

</bundles_post_ra>
